<compile_context>
chip_gen: v7x
topology: tpu7x:2x2x1
jax: 0.10.0
libtpu: 0.0.40
codegen_flags: <defaults>
</compile_context>

<pallas_src>
import math
import functools

import jax
import jax.numpy as jnp
from jax.experimental import pallas as pl
from jax.experimental.pallas import tpu as pltpu


_ACTIVATIONS = {
    'relu': lambda v: jnp.maximum(v, 0.0),
    'gelu': lambda v: jax.nn.gelu(v, approximate=False),
    'tanh': jnp.tanh,
    'sigmoid': jax.nn.sigmoid,
}


# ---------------------------------------------------------------------------
# enc_type == 'sa':  x = act( MultiheadAttention(x, x, x)[0] ), layer_num layers
# fused into one kernel.
# ---------------------------------------------------------------------------
def _sa_stack_kernel(x_ref, wqkv_ref, bqkv_ref, wo_ref, bo_ref, o_ref, *,
                     nhead, nlayers, act, mm_dtype):
    """Fused [QKV-proj -> per-head softmax(QK^T/sqrt(dh)) V -> out-proj -> act]
    repeated `nlayers` times without leaving VMEM/vregs.

    Block shapes:
      x_ref, o_ref : (Bt, S, E)            one tile of batch elements
      wqkv_ref     : (L, E, 3E)            VMEM-resident (constant index_map)
      bqkv_ref     : (L, 1, 3E)
      wo_ref       : (L, E, E)
      bo_ref       : (L, 1, E)
    """
    bt, seq, emb = x_ref.shape
    dh = emb // nhead
    scale = 1.0 / math.sqrt(dh)

    x = x_ref[...].astype(jnp.float32)                       # (Bt, S, E)

    for l in range(nlayers):                                  # static unroll (small L)
        xf = x.reshape(bt * seq, emb)                         # lane/sublane-dense slab

        # Single fused QKV projection: one (Bt*S, E) x (E, 3E) matmul.
        qkv = jnp.dot(xf.astype(mm_dtype), wqkv_ref[l].astype(mm_dtype),
                      preferred_element_type=jnp.float32)
        qkv = (qkv + bqkv_ref[l]).reshape(bt, seq, 3 * emb)   # (Bt, S, 3E)

        # TODO(synk): key_padding_mask / attn_mask (default None in
        # FeatureBlock.forward) are not supported; add masked softmax if needed.
        ctx_heads = []
        for h in range(nhead):                                # static head loop
            qh = qkv[..., h * dh:(h + 1) * dh]                # (Bt, S, dh)
            kh = qkv[..., emb + h * dh:emb + (h + 1) * dh]
            vh = qkv[..., 2 * emb + h * dh:2 * emb + (h + 1) * dh]
            s = jnp.einsum('bqd,bkd->bqk', qh, kh,
                           preferred_element_type=jnp.float32) * scale
            s = s - jnp.max(s, axis=-1, keepdims=True)
            p = jnp.exp(s)
            # EUP reciprocal instead of VPU divide.
            p = p * pl.reciprocal(jnp.sum(p, axis=-1, keepdims=True), approx=True)
            ctx_heads.append(jnp.einsum('bqk,bkd->bqd', p, vh,
                                        preferred_element_type=jnp.float32))
        # Keep context in registers; no VMEM scratch / masked partial stores.
        ctx = jnp.concatenate(ctx_heads, axis=-1).reshape(bt * seq, emb)

        out = jnp.dot(ctx.astype(mm_dtype), wo_ref[l].astype(mm_dtype),
                      preferred_element_type=jnp.float32) + bo_ref[l]
        x = act(out).reshape(bt, seq, emb)

    o_ref[...] = x.astype(o_ref.dtype)


def _pick_batch_tile(batch, seq):
    """Largest divisor of `batch` keeping <= ~1024 rows per grid step: big
    enough to amortize per-step overhead, small enough to leave multiple
    parallel steps (v7x megacore) when the batch is large."""
    max_rows = 1024
    bt = 1
    for cand in range(1, batch + 1):
        if batch % cand == 0 and cand * seq <= max_rows:
            bt = cand
    return bt


def _sa_forward(x, layer_params, *, nhead, act, matmul_dtype):
    B, S, E = x.shape
    L = len(layer_params)
    assert E % nhead == 0, "embed_dim must be divisible by nhead"

    # Pack per-layer weights once in the wrapper (fused QKV + stacked layers).
    w_qkv = jnp.stack([jnp.concatenate([p['wq_t'], p['wk_t'], p['wv_t']], axis=1)
                       for p in layer_params])                           # (L, E, 3E)
    b_qkv = jnp.stack([jnp.concatenate([p['bq'], p['bk'], p['bv']]).reshape(1, 3 * E)
                       for p in layer_params])                           # (L, 1, 3E)
    w_o = jnp.stack([p['wo_t'] for p in layer_params])                   # (L, E, E)
    b_o = jnp.stack([p['bo'].reshape(1, E) for p in layer_params])       # (L, 1, E)

    Bt = _pick_batch_tile(B, S)
    grid = (B // Bt,)

    kernel = functools.partial(_sa_stack_kernel, nhead=nhead, nlayers=L,
                               act=act, mm_dtype=matmul_dtype or jnp.float32)

    def const_spec(shape):
        return pl.BlockSpec(shape, lambda b: (0, 0, 0))   # VMEM-resident

    row_spec = pl.BlockSpec((Bt, S, E), lambda b: (b, 0, 0))

    return pl.pallas_call(
        kernel,
        out_shape=jax.ShapeDtypeStruct((B, S, E), x.dtype),
        grid=grid,
        in_specs=[row_spec,
                  const_spec((L, E, 3 * E)), const_spec((L, 1, 3 * E)),
                  const_spec((L, E, E)), const_spec((L, 1, E))],
        out_specs=row_spec,
        compiler_params=pltpu.CompilerParams(
            dimension_semantics=("parallel",)),
    )(x, w_qkv, b_qkv, w_o, b_o)


# ---------------------------------------------------------------------------
# enc_type == 'mlp':  x = act( x @ W.T )  (no bias), all layers fused.
# ---------------------------------------------------------------------------
def _mlp_stack_kernel(x_ref, w_ref, o_ref, *, nlayers, act, mm_dtype):
    y = x_ref[...].astype(jnp.float32)                       # (TM, E)
    for l in range(nlayers):                                  # activations stay in VMEM/vregs
        y = act(jnp.dot(y.astype(mm_dtype), w_ref[l].astype(mm_dtype),
                        preferred_element_type=jnp.float32))
    o_ref[...] = y.astype(o_ref.dtype)


def _mlp_forward(x, layer_params, *, act, matmul_dtype):
    shape = x.shape
    E = shape[-1]
    L = len(layer_params)
    w = jnp.stack([p['w_t'] for p in layer_params])           # (L, E, E), VMEM-resident

    x2 = x.reshape(-1, E)                                      # lane/sublane-dense slab
    M = x2.shape[0]
    TM = M if M <= 1024 else 1024                              # tall tiles amortize step cost

    kernel = functools.partial(_mlp_stack_kernel, nlayers=L, act=act,
                               mm_dtype=matmul_dtype or jnp.float32)
    out = pl.pallas_call(
        kernel,
        out_shape=jax.ShapeDtypeStruct((M, E), x.dtype),
        grid=(pl.cdiv(M, TM),),
        in_specs=[pl.BlockSpec((TM, E), lambda i: (i, 0)),
                  pl.BlockSpec((L, E, E), lambda i: (0, 0, 0))],
        out_specs=pl.BlockSpec((TM, E), lambda i: (i, 0)),
        compiler_params=pltpu.CompilerParams(
            dimension_semantics=("parallel",)),
    )(x2, w)
    return out.reshape(shape)


# ---------------------------------------------------------------------------
# FeatureBlock.forward (inference; module default dropout=0.0 -> identity)
# ---------------------------------------------------------------------------
def feature_block_forward(x, layer_params, *, enc_type='sa', nhead=4,
                          activation='relu', matmul_dtype=None):
    """matmul_dtype=jnp.bfloat16 routes matmul operands through the native
    bf16 MXU path on v5e (f32 accumulation); elementwise math stays f32."""
    act = _ACTIVATIONS[activation] if isinstance(activation, str) else activation
    if enc_type == 'sa':
        return _sa_forward(x, layer_params, nhead=nhead, act=act,
                           matmul_dtype=matmul_dtype)
    if enc_type == 'mlp':
        return _mlp_forward(x, layer_params, act=act, matmul_dtype=matmul_dtype)
    # TODO(synk): enc_type == 'enc' (nn.TransformerEncoderLayer: MHA + FFN +
    # LayerNorms + residuals) is not translated to a Pallas kernel here.
    raise NotImplementedError("enc_type='enc' is not implemented as a Pallas kernel")


# ---------------------------------------------------------------------------
# Pure-JAX references and demo
# ---------------------------------------------------------------------------
def _init_sa_layer(key, E, dtype=jnp.float32):
    """Random MHA params, pre-transposed for `x @ w_t` use in-kernel
    (torch keeps in_proj_weight [3E, E] and out_proj.weight [E, E]; w*_t = W*.T)."""
    ks = jax.random.split(key, 8)
    s = 1.0 / math.sqrt(E)
    u = lambda k, shape: jax.random.uniform(k, shape, dtype, minval=-s, maxval=s)
    return dict(
        wq_t=u(ks[0], (E, E)), wk_t=u(ks[1], (E, E)),
        wv_t=u(ks[2], (E, E)), wo_t=u(ks[3], (E, E)),
        bq=u(ks[4], (E,)), bk=u(ks[5], (E,)),
        bv=u(ks[6], (E,)), bo=u(ks[7], (E,)),
    )


def _mha_act_ref(x, p, nhead, act):
    B, S, E = x.shape
    dh = E // nhead
    q = (x @ p['wq_t'] + p['bq']).reshape(B, S, nhead, dh)
    k = (x @ p['wk_t'] + p['bk']).reshape(B, S, nhead, dh)
    v = (x @ p['wv_t'] + p['bv']).reshape(B, S, nhead, dh)
    s = jnp.einsum('bqhd,bkhd->bhqk', q, k) / math.sqrt(dh)
    w = jax.nn.softmax(s, axis=-1)
    ctx = jnp.einsum('bhqk,bkhd->bqhd', w, v).reshape(B, S, E)
    return act(ctx @ p['wo_t'] + p['bo'])


if __name__ == "__main__":
    key = jax.random.PRNGKey(0)
    B, S, E, H = 2, 8, 64, 4        # batch=2, seq=8, embed_dim=64, nhead=4 (module defaults)

    k_x, k_sa1, k_sa2, k_m1, k_m2 = jax.random.split(key, 5)
    x = jax.random.normal(k_x, (B, S, E), dtype=jnp.float32)

    # ---- enc_type='sa' (module default), layer_num=2 (fused into one call) ----
    sa_params = [_init_sa_layer(k_sa1, E), _init_sa_layer(k_sa2, E)]
    out_sa = feature_block_forward(x, sa_params, enc_type='sa', nhead=H,
                                   activation='relu')
    jax.block_until_ready(out_sa)
    with jax.default_matmul_precision('highest'):
        ref_sa = x
        for p in sa_params:
            ref_sa = _mha_act_ref(ref_sa, p, H, _ACTIVATIONS['relu'])
    assert out_sa.shape == (B, S, E)
    assert jnp.allclose(out_sa, ref_sa, atol=1e-2, rtol=1e-2), "sa path mismatch"

    # ---- enc_type='mlp', layer_num=2 (fused into one call) ----
    s_ = 1.0 / math.sqrt(E)
    mlp_params = [
        {'w_t': jax.random.uniform(k_m1, (E, E), jnp.float32, minval=-s_, maxval=s_)},
        {'w_t': jax.random.uniform(k_m2, (E, E), jnp.float32, minval=-s_, maxval=s_)},
    ]
    out_mlp = feature_block_forward(x, mlp_params, enc_type='mlp',
                                    activation='relu')
    jax.block_until_ready(out_mlp)
    with jax.default_matmul_precision('highest'):
        ref_mlp = x
        for p in mlp_params:
            ref_mlp = jnp.maximum(ref_mlp @ p['w_t'], 0.0)
    assert out_mlp.shape == (B, S, E)
    assert jnp.allclose(out_mlp, ref_mlp, atol=1e-2, rtol=1e-2), "mlp path mismatch"

    print("KERNEL_OK")
</pallas_src>

<mosaic_0001>
module attributes {stable_mosaic.version = 11 : i64} {
  func.func @_sa_stack_kernel(%arg0: i32, %arg1: memref<2x8x64xf32, #tpu.memory_space<vmem>>, %arg2: memref<2x64x192xf32, #tpu.memory_space<vmem>>, %arg3: memref<2x1x192xf32, #tpu.memory_space<vmem>>, %arg4: memref<2x64x64xf32, #tpu.memory_space<vmem>>, %arg5: memref<2x1x64xf32, #tpu.memory_space<vmem>>, %arg6: memref<2x8x64xf32, #tpu.memory_space<vmem>>) attributes {dimension_semantics = [#tpu.dimension_semantics<parallel>], iteration_bounds = array<i64: 1>, scalar_prefetch = 0 : i64, scratch_operands = 0 : i64, tpu.core_type = #tpu.core_type<tc>, window_params = [{transform_indices = @transform_0, window_bounds = array<i64: 2, 8, 64>}, {pipeline_mode = #tpu.pipeline_mode<synchronous>, transform_indices = @transform_1, window_bounds = array<i64: 2, 64, 192>}, {pipeline_mode = #tpu.pipeline_mode<synchronous>, transform_indices = @transform_2, window_bounds = array<i64: 2, 1, 192>}, {pipeline_mode = #tpu.pipeline_mode<synchronous>, transform_indices = @transform_3, window_bounds = array<i64: 2, 64, 64>}, {pipeline_mode = #tpu.pipeline_mode<synchronous>, transform_indices = @transform_4, window_bounds = array<i64: 2, 1, 64>}, {transform_indices = @transform_5, window_bounds = array<i64: 2, 8, 64>}]} {
    %c0 = arith.constant 0 : index
    %c0_0 = arith.constant 0 : index
    %c0_1 = arith.constant 0 : index
    %0 = vector.load %arg1[%c0, %c0_0, %c0_1] : memref<2x8x64xf32, #tpu.memory_space<vmem>>, vector<2x8x64xf32>
    %1 = vector.shape_cast %0 : vector<2x8x64xf32> to vector<16x64xf32>
    %c0_2 = arith.constant 0 : index
    %c0_3 = arith.constant 0 : index
    %c0_4 = arith.constant 0 : index
    %2 = vector.load %arg2[%c0_2, %c0_3, %c0_4] : memref<2x64x192xf32, #tpu.memory_space<vmem>>, vector<1x64x192xf32>
    %3 = vector.shape_cast %2 : vector<1x64x192xf32> to vector<64x192xf32>
    %cst = arith.constant dense<0.000000e+00> : vector<16x192xf32>
    %4 = tpu.matmul %1, %3, %cst {dimension_numbers = #tpu.dot_dimension_numbers<[1], [0], [0], [1], [0, 0, 1, 1], [], []>} : vector<16x64xf32>, vector<64x192xf32>, vector<16x192xf32> -> vector<16x192xf32>
    %c0_5 = arith.constant 0 : index
    %c0_6 = arith.constant 0 : index
    %c0_7 = arith.constant 0 : index
    %5 = vector.load %arg3[%c0_5, %c0_6, %c0_7] : memref<2x1x192xf32, #tpu.memory_space<vmem>>, vector<1x1x192xf32>
    %6 = vector.shape_cast %5 : vector<1x1x192xf32> to vector<1x192xf32>
    %7 = vector.broadcast %6 : vector<1x192xf32> to vector<16x192xf32>
    %8 = arith.addf %4, %7 : vector<16x192xf32>
    %9 = vector.shape_cast %8 : vector<16x192xf32> to vector<2x8x192xf32>
    %10 = vector.extract_strided_slice %9 {offsets = [0, 0, 0], sizes = [2, 8, 16], strides = [1, 1, 1]} : vector<2x8x192xf32> to vector<2x8x16xf32>
    %11 = vector.extract_strided_slice %9 {offsets = [0, 0, 64], sizes = [2, 8, 16], strides = [1, 1, 1]} : vector<2x8x192xf32> to vector<2x8x16xf32>
    %12 = vector.extract_strided_slice %9 {offsets = [0, 0, 128], sizes = [2, 8, 16], strides = [1, 1, 1]} : vector<2x8x192xf32> to vector<2x8x16xf32>
    "tpu.trace_start"() <{level = 10 : i32, message = "bqd,bkd->bqk"}> : () -> ()
    %cst_8 = arith.constant dense<0.000000e+00> : vector<2x8x8xf32>
    %13 = tpu.matmul %10, %11, %cst_8 {dimension_numbers = #tpu.dot_dimension_numbers<[2], [2], [1], [1], [0, 0, 0, 1, 1, 1], [0], [0]>} : vector<2x8x16xf32>, vector<2x8x16xf32>, vector<2x8x8xf32> -> vector<2x8x8xf32>
    "tpu.trace_stop"() : () -> ()
    %cst_9 = arith.constant 2.500000e-01 : f32
    %14 = vector.broadcast %cst_9 : f32 to vector<2x8x8xf32>
    %15 = arith.mulf %13, %14 : vector<2x8x8xf32>
    %cst_10 = arith.constant dense<0xFF800000> : vector<2x8xf32>
    %16 = vector.multi_reduction <maximumf>, %15, %cst_10 [2] : vector<2x8x8xf32> to vector<2x8xf32>
    %17 = vector.shape_cast %16 : vector<2x8xf32> to vector<2x8x1xf32>
    %18 = vector.broadcast %17 : vector<2x8x1xf32> to vector<2x8x8xf32>
    %19 = arith.subf %15, %18 : vector<2x8x8xf32>
    %20 = math.exp %19 : vector<2x8x8xf32>
    %cst_11 = arith.constant dense<0.000000e+00> : vector<2x8xf32>
    %21 = vector.multi_reduction <add>, %20, %cst_11 [2] : vector<2x8x8xf32> to vector<2x8xf32>
    %22 = vector.shape_cast %21 : vector<2x8xf32> to vector<2x8x1xf32>
    %23 = tpu.reciprocal %22 {approx = true} : vector<2x8x1xf32> -> vector<2x8x1xf32>
    %24 = vector.broadcast %23 : vector<2x8x1xf32> to vector<2x8x8xf32>
    %25 = arith.mulf %20, %24 : vector<2x8x8xf32>
    "tpu.trace_start"() <{level = 10 : i32, message = "bqk,bkd->bqd"}> : () -> ()
    %cst_12 = arith.constant dense<0.000000e+00> : vector<2x8x16xf32>
    %26 = tpu.matmul %25, %12, %cst_12 {dimension_numbers = #tpu.dot_dimension_numbers<[2], [1], [1], [2], [0, 0, 0, 1, 1, 2], [0], [0]>} : vector<2x8x8xf32>, vector<2x8x16xf32>, vector<2x8x16xf32> -> vector<2x8x16xf32>
    "tpu.trace_stop"() : () -> ()
    %27 = vector.extract_strided_slice %9 {offsets = [0, 0, 16], sizes = [2, 8, 16], strides = [1, 1, 1]} : vector<2x8x192xf32> to vector<2x8x16xf32>
    %28 = vector.extract_strided_slice %9 {offsets = [0, 0, 80], sizes = [2, 8, 16], strides = [1, 1, 1]} : vector<2x8x192xf32> to vector<2x8x16xf32>
    %29 = vector.extract_strided_slice %9 {offsets = [0, 0, 144], sizes = [2, 8, 16], strides = [1, 1, 1]} : vector<2x8x192xf32> to vector<2x8x16xf32>
    "tpu.trace_start"() <{level = 10 : i32, message = "bqd,bkd->bqk"}> : () -> ()
    %cst_13 = arith.constant dense<0.000000e+00> : vector<2x8x8xf32>
    %30 = tpu.matmul %27, %28, %cst_13 {dimension_numbers = #tpu.dot_dimension_numbers<[2], [2], [1], [1], [0, 0, 0, 1, 1, 1], [0], [0]>} : vector<2x8x16xf32>, vector<2x8x16xf32>, vector<2x8x8xf32> -> vector<2x8x8xf32>
    "tpu.trace_stop"() : () -> ()
    %cst_14 = arith.constant 2.500000e-01 : f32
    %31 = vector.broadcast %cst_14 : f32 to vector<2x8x8xf32>
    %32 = arith.mulf %30, %31 : vector<2x8x8xf32>
    %cst_15 = arith.constant dense<0xFF800000> : vector<2x8xf32>
    %33 = vector.multi_reduction <maximumf>, %32, %cst_15 [2] : vector<2x8x8xf32> to vector<2x8xf32>
    %34 = vector.shape_cast %33 : vector<2x8xf32> to vector<2x8x1xf32>
    %35 = vector.broadcast %34 : vector<2x8x1xf32> to vector<2x8x8xf32>
    %36 = arith.subf %32, %35 : vector<2x8x8xf32>
    %37 = math.exp %36 : vector<2x8x8xf32>
    %cst_16 = arith.constant dense<0.000000e+00> : vector<2x8xf32>
    %38 = vector.multi_reduction <add>, %37, %cst_16 [2] : vector<2x8x8xf32> to vector<2x8xf32>
    %39 = vector.shape_cast %38 : vector<2x8xf32> to vector<2x8x1xf32>
    %40 = tpu.reciprocal %39 {approx = true} : vector<2x8x1xf32> -> vector<2x8x1xf32>
    %41 = vector.broadcast %40 : vector<2x8x1xf32> to vector<2x8x8xf32>
    %42 = arith.mulf %37, %41 : vector<2x8x8xf32>
    "tpu.trace_start"() <{level = 10 : i32, message = "bqk,bkd->bqd"}> : () -> ()
    %cst_17 = arith.constant dense<0.000000e+00> : vector<2x8x16xf32>
    %43 = tpu.matmul %42, %29, %cst_17 {dimension_numbers = #tpu.dot_dimension_numbers<[2], [1], [1], [2], [0, 0, 0, 1, 1, 2], [0], [0]>} : vector<2x8x8xf32>, vector<2x8x16xf32>, vector<2x8x16xf32> -> vector<2x8x16xf32>
    "tpu.trace_stop"() : () -> ()
    %44 = vector.extract_strided_slice %9 {offsets = [0, 0, 32], sizes = [2, 8, 16], strides = [1, 1, 1]} : vector<2x8x192xf32> to vector<2x8x16xf32>
    %45 = vector.extract_strided_slice %9 {offsets = [0, 0, 96], sizes = [2, 8, 16], strides = [1, 1, 1]} : vector<2x8x192xf32> to vector<2x8x16xf32>
    %46 = vector.extract_strided_slice %9 {offsets = [0, 0, 160], sizes = [2, 8, 16], strides = [1, 1, 1]} : vector<2x8x192xf32> to vector<2x8x16xf32>
    "tpu.trace_start"() <{level = 10 : i32, message = "bqd,bkd->bqk"}> : () -> ()
    %cst_18 = arith.constant dense<0.000000e+00> : vector<2x8x8xf32>
    %47 = tpu.matmul %44, %45, %cst_18 {dimension_numbers = #tpu.dot_dimension_numbers<[2], [2], [1], [1], [0, 0, 0, 1, 1, 1], [0], [0]>} : vector<2x8x16xf32>, vector<2x8x16xf32>, vector<2x8x8xf32> -> vector<2x8x8xf32>
    "tpu.trace_stop"() : () -> ()
    %cst_19 = arith.constant 2.500000e-01 : f32
    %48 = vector.broadcast %cst_19 : f32 to vector<2x8x8xf32>
    %49 = arith.mulf %47, %48 : vector<2x8x8xf32>
    %cst_20 = arith.constant dense<0xFF800000> : vector<2x8xf32>
    %50 = vector.multi_reduction <maximumf>, %49, %cst_20 [2] : vector<2x8x8xf32> to vector<2x8xf32>
    %51 = vector.shape_cast %50 : vector<2x8xf32> to vector<2x8x1xf32>
    %52 = vector.broadcast %51 : vector<2x8x1xf32> to vector<2x8x8xf32>
    %53 = arith.subf %49, %52 : vector<2x8x8xf32>
    %54 = math.exp %53 : vector<2x8x8xf32>
    %cst_21 = arith.constant dense<0.000000e+00> : vector<2x8xf32>
    %55 = vector.multi_reduction <add>, %54, %cst_21 [2] : vector<2x8x8xf32> to vector<2x8xf32>
    %56 = vector.shape_cast %55 : vector<2x8xf32> to vector<2x8x1xf32>
    %57 = tpu.reciprocal %56 {approx = true} : vector<2x8x1xf32> -> vector<2x8x1xf32>
    %58 = vector.broadcast %57 : vector<2x8x1xf32> to vector<2x8x8xf32>
    %59 = arith.mulf %54, %58 : vector<2x8x8xf32>
    "tpu.trace_start"() <{level = 10 : i32, message = "bqk,bkd->bqd"}> : () -> ()
    %cst_22 = arith.constant dense<0.000000e+00> : vector<2x8x16xf32>
    %60 = tpu.matmul %59, %46, %cst_22 {dimension_numbers = #tpu.dot_dimension_numbers<[2], [1], [1], [2], [0, 0, 0, 1, 1, 2], [0], [0]>} : vector<2x8x8xf32>, vector<2x8x16xf32>, vector<2x8x16xf32> -> vector<2x8x16xf32>
    "tpu.trace_stop"() : () -> ()
    %61 = vector.extract_strided_slice %9 {offsets = [0, 0, 48], sizes = [2, 8, 16], strides = [1, 1, 1]} : vector<2x8x192xf32> to vector<2x8x16xf32>
    %62 = vector.extract_strided_slice %9 {offsets = [0, 0, 112], sizes = [2, 8, 16], strides = [1, 1, 1]} : vector<2x8x192xf32> to vector<2x8x16xf32>
    %63 = vector.extract_strided_slice %9 {offsets = [0, 0, 176], sizes = [2, 8, 16], strides = [1, 1, 1]} : vector<2x8x192xf32> to vector<2x8x16xf32>
    "tpu.trace_start"() <{level = 10 : i32, message = "bqd,bkd->bqk"}> : () -> ()
    %cst_23 = arith.constant dense<0.000000e+00> : vector<2x8x8xf32>
    %64 = tpu.matmul %61, %62, %cst_23 {dimension_numbers = #tpu.dot_dimension_numbers<[2], [2], [1], [1], [0, 0, 0, 1, 1, 1], [0], [0]>} : vector<2x8x16xf32>, vector<2x8x16xf32>, vector<2x8x8xf32> -> vector<2x8x8xf32>
    "tpu.trace_stop"() : () -> ()
    %cst_24 = arith.constant 2.500000e-01 : f32
    %65 = vector.broadcast %cst_24 : f32 to vector<2x8x8xf32>
    %66 = arith.mulf %64, %65 : vector<2x8x8xf32>
    %cst_25 = arith.constant dense<0xFF800000> : vector<2x8xf32>
    %67 = vector.multi_reduction <maximumf>, %66, %cst_25 [2] : vector<2x8x8xf32> to vector<2x8xf32>
    %68 = vector.shape_cast %67 : vector<2x8xf32> to vector<2x8x1xf32>
    %69 = vector.broadcast %68 : vector<2x8x1xf32> to vector<2x8x8xf32>
    %70 = arith.subf %66, %69 : vector<2x8x8xf32>
    %71 = math.exp %70 : vector<2x8x8xf32>
    %cst_26 = arith.constant dense<0.000000e+00> : vector<2x8xf32>
    %72 = vector.multi_reduction <add>, %71, %cst_26 [2] : vector<2x8x8xf32> to vector<2x8xf32>
    %73 = vector.shape_cast %72 : vector<2x8xf32> to vector<2x8x1xf32>
    %74 = tpu.reciprocal %73 {approx = true} : vector<2x8x1xf32> -> vector<2x8x1xf32>
    %75 = vector.broadcast %74 : vector<2x8x1xf32> to vector<2x8x8xf32>
    %76 = arith.mulf %71, %75 : vector<2x8x8xf32>
    "tpu.trace_start"() <{level = 10 : i32, message = "bqk,bkd->bqd"}> : () -> ()
    %cst_27 = arith.constant dense<0.000000e+00> : vector<2x8x16xf32>
    %77 = tpu.matmul %76, %63, %cst_27 {dimension_numbers = #tpu.dot_dimension_numbers<[2], [1], [1], [2], [0, 0, 0, 1, 1, 2], [0], [0]>} : vector<2x8x8xf32>, vector<2x8x16xf32>, vector<2x8x16xf32> -> vector<2x8x16xf32>
    "tpu.trace_stop"() : () -> ()
    %78 = tpu.concatenate %26, %43, %60, %77 in 2 : vector<2x8x16xf32>, vector<2x8x16xf32>, vector<2x8x16xf32>, vector<2x8x16xf32> -> vector<2x8x64xf32>
    %79 = vector.shape_cast %78 : vector<2x8x64xf32> to vector<16x64xf32>
    %c0_28 = arith.constant 0 : index
    %c0_29 = arith.constant 0 : index
    %c0_30 = arith.constant 0 : index
    %80 = vector.load %arg4[%c0_28, %c0_29, %c0_30] : memref<2x64x64xf32, #tpu.memory_space<vmem>>, vector<1x64x64xf32>
    %81 = vector.shape_cast %80 : vector<1x64x64xf32> to vector<64x64xf32>
    %cst_31 = arith.constant dense<0.000000e+00> : vector<16x64xf32>
    %82 = tpu.matmul %79, %81, %cst_31 {dimension_numbers = #tpu.dot_dimension_numbers<[1], [0], [0], [1], [0, 0, 1, 1], [], []>} : vector<16x64xf32>, vector<64x64xf32>, vector<16x64xf32> -> vector<16x64xf32>
    %c0_32 = arith.constant 0 : index
    %c0_33 = arith.constant 0 : index
    %c0_34 = arith.constant 0 : index
    %83 = vector.load %arg5[%c0_32, %c0_33, %c0_34] : memref<2x1x64xf32, #tpu.memory_space<vmem>>, vector<1x1x64xf32>
    %84 = vector.shape_cast %83 : vector<1x1x64xf32> to vector<1x64xf32>
    %85 = vector.broadcast %84 : vector<1x64xf32> to vector<16x64xf32>
    %86 = arith.addf %82, %85 : vector<16x64xf32>
    %cst_35 = arith.constant 0.000000e+00 : f32
    %87 = vector.broadcast %cst_35 : f32 to vector<16x64xf32>
    %88 = arith.maximumf %86, %87 : vector<16x64xf32>
    %89 = vector.shape_cast %88 : vector<16x64xf32> to vector<2x8x64xf32>
    %90 = vector.shape_cast %89 : vector<2x8x64xf32> to vector<16x64xf32>
    %c1 = arith.constant 1 : index
    %c0_36 = arith.constant 0 : index
    %c0_37 = arith.constant 0 : index
    %91 = vector.load %arg2[%c1, %c0_36, %c0_37] : memref<2x64x192xf32, #tpu.memory_space<vmem>>, vector<1x64x192xf32>
    %92 = vector.shape_cast %91 : vector<1x64x192xf32> to vector<64x192xf32>
    %cst_38 = arith.constant dense<0.000000e+00> : vector<16x192xf32>
    %93 = tpu.matmul %90, %92, %cst_38 {dimension_numbers = #tpu.dot_dimension_numbers<[1], [0], [0], [1], [0, 0, 1, 1], [], []>} : vector<16x64xf32>, vector<64x192xf32>, vector<16x192xf32> -> vector<16x192xf32>
    %c1_39 = arith.constant 1 : index
    %c0_40 = arith.constant 0 : index
    %c0_41 = arith.constant 0 : index
    %94 = vector.load %arg3[%c1_39, %c0_40, %c0_41] : memref<2x1x192xf32, #tpu.memory_space<vmem>>, vector<1x1x192xf32>
    %95 = vector.shape_cast %94 : vector<1x1x192xf32> to vector<1x192xf32>
    %96 = vector.broadcast %95 : vector<1x192xf32> to vector<16x192xf32>
    %97 = arith.addf %93, %96 : vector<16x192xf32>
    %98 = vector.shape_cast %97 : vector<16x192xf32> to vector<2x8x192xf32>
    %99 = vector.extract_strided_slice %98 {offsets = [0, 0, 0], sizes = [2, 8, 16], strides = [1, 1, 1]} : vector<2x8x192xf32> to vector<2x8x16xf32>
    %100 = vector.extract_strided_slice %98 {offsets = [0, 0, 64], sizes = [2, 8, 16], strides = [1, 1, 1]} : vector<2x8x192xf32> to vector<2x8x16xf32>
    %101 = vector.extract_strided_slice %98 {offsets = [0, 0, 128], sizes = [2, 8, 16], strides = [1, 1, 1]} : vector<2x8x192xf32> to vector<2x8x16xf32>
    "tpu.trace_start"() <{level = 10 : i32, message = "bqd,bkd->bqk"}> : () -> ()
    %cst_42 = arith.constant dense<0.000000e+00> : vector<2x8x8xf32>
    %102 = tpu.matmul %99, %100, %cst_42 {dimension_numbers = #tpu.dot_dimension_numbers<[2], [2], [1], [1], [0, 0, 0, 1, 1, 1], [0], [0]>} : vector<2x8x16xf32>, vector<2x8x16xf32>, vector<2x8x8xf32> -> vector<2x8x8xf32>
    "tpu.trace_stop"() : () -> ()
    %cst_43 = arith.constant 2.500000e-01 : f32
    %103 = vector.broadcast %cst_43 : f32 to vector<2x8x8xf32>
    %104 = arith.mulf %102, %103 : vector<2x8x8xf32>
    %cst_44 = arith.constant dense<0xFF800000> : vector<2x8xf32>
    %105 = vector.multi_reduction <maximumf>, %104, %cst_44 [2] : vector<2x8x8xf32> to vector<2x8xf32>
    %106 = vector.shape_cast %105 : vector<2x8xf32> to vector<2x8x1xf32>
    %107 = vector.broadcast %106 : vector<2x8x1xf32> to vector<2x8x8xf32>
    %108 = arith.subf %104, %107 : vector<2x8x8xf32>
    %109 = math.exp %108 : vector<2x8x8xf32>
    %cst_45 = arith.constant dense<0.000000e+00> : vector<2x8xf32>
    %110 = vector.multi_reduction <add>, %109, %cst_45 [2] : vector<2x8x8xf32> to vector<2x8xf32>
    %111 = vector.shape_cast %110 : vector<2x8xf32> to vector<2x8x1xf32>
    %112 = tpu.reciprocal %111 {approx = true} : vector<2x8x1xf32> -> vector<2x8x1xf32>
    %113 = vector.broadcast %112 : vector<2x8x1xf32> to vector<2x8x8xf32>
    %114 = arith.mulf %109, %113 : vector<2x8x8xf32>
    "tpu.trace_start"() <{level = 10 : i32, message = "bqk,bkd->bqd"}> : () -> ()
    %cst_46 = arith.constant dense<0.000000e+00> : vector<2x8x16xf32>
    %115 = tpu.matmul %114, %101, %cst_46 {dimension_numbers = #tpu.dot_dimension_numbers<[2], [1], [1], [2], [0, 0, 0, 1, 1, 2], [0], [0]>} : vector<2x8x8xf32>, vector<2x8x16xf32>, vector<2x8x16xf32> -> vector<2x8x16xf32>
    "tpu.trace_stop"() : () -> ()
    %116 = vector.extract_strided_slice %98 {offsets = [0, 0, 16], sizes = [2, 8, 16], strides = [1, 1, 1]} : vector<2x8x192xf32> to vector<2x8x16xf32>
    %117 = vector.extract_strided_slice %98 {offsets = [0, 0, 80], sizes = [2, 8, 16], strides = [1, 1, 1]} : vector<2x8x192xf32> to vector<2x8x16xf32>
    %118 = vector.extract_strided_slice %98 {offsets = [0, 0, 144], sizes = [2, 8, 16], strides = [1, 1, 1]} : vector<2x8x192xf32> to vector<2x8x16xf32>
    "tpu.trace_start"() <{level = 10 : i32, message = "bqd,bkd->bqk"}> : () -> ()
    %cst_47 = arith.constant dense<0.000000e+00> : vector<2x8x8xf32>
    %119 = tpu.matmul %116, %117, %cst_47 {dimension_numbers = #tpu.dot_dimension_numbers<[2], [2], [1], [1], [0, 0, 0, 1, 1, 1], [0], [0]>} : vector<2x8x16xf32>, vector<2x8x16xf32>, vector<2x8x8xf32> -> vector<2x8x8xf32>
    "tpu.trace_stop"() : () -> ()
    %cst_48 = arith.constant 2.500000e-01 : f32
    %120 = vector.broadcast %cst_48 : f32 to vector<2x8x8xf32>
    %121 = arith.mulf %119, %120 : vector<2x8x8xf32>
    %cst_49 = arith.constant dense<0xFF800000> : vector<2x8xf32>
    %122 = vector.multi_reduction <maximumf>, %121, %cst_49 [2] : vector<2x8x8xf32> to vector<2x8xf32>
    %123 = vector.shape_cast %122 : vector<2x8xf32> to vector<2x8x1xf32>
    %124 = vector.broadcast %123 : vector<2x8x1xf32> to vector<2x8x8xf32>
    %125 = arith.subf %121, %124 : vector<2x8x8xf32>
    %126 = math.exp %125 : vector<2x8x8xf32>
    %cst_50 = arith.constant dense<0.000000e+00> : vector<2x8xf32>
    %127 = vector.multi_reduction <add>, %126, %cst_50 [2] : vector<2x8x8xf32> to vector<2x8xf32>
    %128 = vector.shape_cast %127 : vector<2x8xf32> to vector<2x8x1xf32>
    %129 = tpu.reciprocal %128 {approx = true} : vector<2x8x1xf32> -> vector<2x8x1xf32>
    %130 = vector.broadcast %129 : vector<2x8x1xf32> to vector<2x8x8xf32>
    %131 = arith.mulf %126, %130 : vector<2x8x8xf32>
    "tpu.trace_start"() <{level = 10 : i32, message = "bqk,bkd->bqd"}> : () -> ()
    %cst_51 = arith.constant dense<0.000000e+00> : vector<2x8x16xf32>
    %132 = tpu.matmul %131, %118, %cst_51 {dimension_numbers = #tpu.dot_dimension_numbers<[2], [1], [1], [2], [0, 0, 0, 1, 1, 2], [0], [0]>} : vector<2x8x8xf32>, vector<2x8x16xf32>, vector<2x8x16xf32> -> vector<2x8x16xf32>
    "tpu.trace_stop"() : () -> ()
    %133 = vector.extract_strided_slice %98 {offsets = [0, 0, 32], sizes = [2, 8, 16], strides = [1, 1, 1]} : vector<2x8x192xf32> to vector<2x8x16xf32>
    %134 = vector.extract_strided_slice %98 {offsets = [0, 0, 96], sizes = [2, 8, 16], strides = [1, 1, 1]} : vector<2x8x192xf32> to vector<2x8x16xf32>
    %135 = vector.extract_strided_slice %98 {offsets = [0, 0, 160], sizes = [2, 8, 16], strides = [1, 1, 1]} : vector<2x8x192xf32> to vector<2x8x16xf32>
    "tpu.trace_start"() <{level = 10 : i32, message = "bqd,bkd->bqk"}> : () -> ()
    %cst_52 = arith.constant dense<0.000000e+00> : vector<2x8x8xf32>
    %136 = tpu.matmul %133, %134, %cst_52 {dimension_numbers = #tpu.dot_dimension_numbers<[2], [2], [1], [1], [0, 0, 0, 1, 1, 1], [0], [0]>} : vector<2x8x16xf32>, vector<2x8x16xf32>, vector<2x8x8xf32> -> vector<2x8x8xf32>
    "tpu.trace_stop"() : () -> ()
    %cst_53 = arith.constant 2.500000e-01 : f32
    %137 = vector.broadcast %cst_53 : f32 to vector<2x8x8xf32>
    %138 = arith.mulf %136, %137 : vector<2x8x8xf32>
    %cst_54 = arith.constant dense<0xFF800000> : vector<2x8xf32>
    %139 = vector.multi_reduction <maximumf>, %138, %cst_54 [2] : vector<2x8x8xf32> to vector<2x8xf32>
    %140 = vector.shape_cast %139 : vector<2x8xf32> to vector<2x8x1xf32>
    %141 = vector.broadcast %140 : vector<2x8x1xf32> to vector<2x8x8xf32>
    %142 = arith.subf %138, %141 : vector<2x8x8xf32>
    %143 = math.exp %142 : vector<2x8x8xf32>
    %cst_55 = arith.constant dense<0.000000e+00> : vector<2x8xf32>
    %144 = vector.multi_reduction <add>, %143, %cst_55 [2] : vector<2x8x8xf32> to vector<2x8xf32>
    %145 = vector.shape_cast %144 : vector<2x8xf32> to vector<2x8x1xf32>
    %146 = tpu.reciprocal %145 {approx = true} : vector<2x8x1xf32> -> vector<2x8x1xf32>
    %147 = vector.broadcast %146 : vector<2x8x1xf32> to vector<2x8x8xf32>
    %148 = arith.mulf %143, %147 : vector<2x8x8xf32>
    "tpu.trace_start"() <{level = 10 : i32, message = "bqk,bkd->bqd"}> : () -> ()
    %cst_56 = arith.constant dense<0.000000e+00> : vector<2x8x16xf32>
    %149 = tpu.matmul %148, %135, %cst_56 {dimension_numbers = #tpu.dot_dimension_numbers<[2], [1], [1], [2], [0, 0, 0, 1, 1, 2], [0], [0]>} : vector<2x8x8xf32>, vector<2x8x16xf32>, vector<2x8x16xf32> -> vector<2x8x16xf32>
    "tpu.trace_stop"() : () -> ()
    %150 = vector.extract_strided_slice %98 {offsets = [0, 0, 48], sizes = [2, 8, 16], strides = [1, 1, 1]} : vector<2x8x192xf32> to vector<2x8x16xf32>
    %151 = vector.extract_strided_slice %98 {offsets = [0, 0, 112], sizes = [2, 8, 16], strides = [1, 1, 1]} : vector<2x8x192xf32> to vector<2x8x16xf32>
    %152 = vector.extract_strided_slice %98 {offsets = [0, 0, 176], sizes = [2, 8, 16], strides = [1, 1, 1]} : vector<2x8x192xf32> to vector<2x8x16xf32>
    "tpu.trace_start"() <{level = 10 : i32, message = "bqd,bkd->bqk"}> : () -> ()
    %cst_57 = arith.constant dense<0.000000e+00> : vector<2x8x8xf32>
    %153 = tpu.matmul %150, %151, %cst_57 {dimension_numbers = #tpu.dot_dimension_numbers<[2], [2], [1], [1], [0, 0, 0, 1, 1, 1], [0], [0]>} : vector<2x8x16xf32>, vector<2x8x16xf32>, vector<2x8x8xf32> -> vector<2x8x8xf32>
    "tpu.trace_stop"() : () -> ()
    %cst_58 = arith.constant 2.500000e-01 : f32
    %154 = vector.broadcast %cst_58 : f32 to vector<2x8x8xf32>
    %155 = arith.mulf %153, %154 : vector<2x8x8xf32>
    %cst_59 = arith.constant dense<0xFF800000> : vector<2x8xf32>
    %156 = vector.multi_reduction <maximumf>, %155, %cst_59 [2] : vector<2x8x8xf32> to vector<2x8xf32>
    %157 = vector.shape_cast %156 : vector<2x8xf32> to vector<2x8x1xf32>
    %158 = vector.broadcast %157 : vector<2x8x1xf32> to vector<2x8x8xf32>
    %159 = arith.subf %155, %158 : vector<2x8x8xf32>
    %160 = math.exp %159 : vector<2x8x8xf32>
    %cst_60 = arith.constant dense<0.000000e+00> : vector<2x8xf32>
    %161 = vector.multi_reduction <add>, %160, %cst_60 [2] : vector<2x8x8xf32> to vector<2x8xf32>
    %162 = vector.shape_cast %161 : vector<2x8xf32> to vector<2x8x1xf32>
    %163 = tpu.reciprocal %162 {approx = true} : vector<2x8x1xf32> -> vector<2x8x1xf32>
    %164 = vector.broadcast %163 : vector<2x8x1xf32> to vector<2x8x8xf32>
    %165 = arith.mulf %160, %164 : vector<2x8x8xf32>
    "tpu.trace_start"() <{level = 10 : i32, message = "bqk,bkd->bqd"}> : () -> ()
    %cst_61 = arith.constant dense<0.000000e+00> : vector<2x8x16xf32>
    %166 = tpu.matmul %165, %152, %cst_61 {dimension_numbers = #tpu.dot_dimension_numbers<[2], [1], [1], [2], [0, 0, 0, 1, 1, 2], [0], [0]>} : vector<2x8x8xf32>, vector<2x8x16xf32>, vector<2x8x16xf32> -> vector<2x8x16xf32>
    "tpu.trace_stop"() : () -> ()
    %167 = tpu.concatenate %115, %132, %149, %166 in 2 : vector<2x8x16xf32>, vector<2x8x16xf32>, vector<2x8x16xf32>, vector<2x8x16xf32> -> vector<2x8x64xf32>
    %168 = vector.shape_cast %167 : vector<2x8x64xf32> to vector<16x64xf32>
    %c1_62 = arith.constant 1 : index
    %c0_63 = arith.constant 0 : index
    %c0_64 = arith.constant 0 : index
    %169 = vector.load %arg4[%c1_62, %c0_63, %c0_64] : memref<2x64x64xf32, #tpu.memory_space<vmem>>, vector<1x64x64xf32>
    %170 = vector.shape_cast %169 : vector<1x64x64xf32> to vector<64x64xf32>
    %cst_65 = arith.constant dense<0.000000e+00> : vector<16x64xf32>
    %171 = tpu.matmul %168, %170, %cst_65 {dimension_numbers = #tpu.dot_dimension_numbers<[1], [0], [0], [1], [0, 0, 1, 1], [], []>} : vector<16x64xf32>, vector<64x64xf32>, vector<16x64xf32> -> vector<16x64xf32>
    %c1_66 = arith.constant 1 : index
    %c0_67 = arith.constant 0 : index
    %c0_68 = arith.constant 0 : index
    %172 = vector.load %arg5[%c1_66, %c0_67, %c0_68] : memref<2x1x64xf32, #tpu.memory_space<vmem>>, vector<1x1x64xf32>
    %173 = vector.shape_cast %172 : vector<1x1x64xf32> to vector<1x64xf32>
    %174 = vector.broadcast %173 : vector<1x64xf32> to vector<16x64xf32>
    %175 = arith.addf %171, %174 : vector<16x64xf32>
    %cst_69 = arith.constant 0.000000e+00 : f32
    %176 = vector.broadcast %cst_69 : f32 to vector<16x64xf32>
    %177 = arith.maximumf %175, %176 : vector<16x64xf32>
    %178 = vector.shape_cast %177 : vector<16x64xf32> to vector<2x8x64xf32>
    %c0_70 = arith.constant 0 : index
    %c0_71 = arith.constant 0 : index
    %c0_72 = arith.constant 0 : index
    %179 = vector.load %arg6[%c0_70, %c0_71, %c0_72] : memref<2x8x64xf32, #tpu.memory_space<vmem>>, vector<2x8x64xf32>
    tpu.vector_store %arg6[%c0_70, %c0_71, %c0_72], %178 {strides = array<i32>} : memref<2x8x64xf32, #tpu.memory_space<vmem>>, vector<2x8x64xf32>,
    return
  }
  func.func @transform_0(%arg0: i32) -> (i32, i32, i32) {
    %c0_i32 = arith.constant 0 : i32
    %c0_i32_0 = arith.constant 0 : i32
    %c0_i32_1 = arith.constant 0 : i32
    return %arg0, %c0_i32, %c0_i32_0 : i32, i32, i32
  }
  func.func @transform_1(%arg0: i32) -> (i32, i32, i32) {
    %c0_i32 = arith.constant 0 : i32
    %c0_i32_0 = arith.constant 0 : i32
    %c0_i32_1 = arith.constant 0 : i32
    %c0_i32_2 = arith.constant 0 : i32
    return %c0_i32, %c0_i32_0, %c0_i32_1 : i32, i32, i32
  }
  func.func @transform_2(%arg0: i32) -> (i32, i32, i32) {
    %c0_i32 = arith.constant 0 : i32
    %c0_i32_0 = arith.constant 0 : i32
    %c0_i32_1 = arith.constant 0 : i32
    %c0_i32_2 = arith.constant 0 : i32
    return %c0_i32, %c0_i32_0, %c0_i32_1 : i32, i32, i32
  }
  func.func @transform_3(%arg0: i32) -> (i32, i32, i32) {
    %c0_i32 = arith.constant 0 : i32
    %c0_i32_0 = arith.constant 0 : i32
    %c0_i32_1 = arith.constant 0 : i32
    %c0_i32_2 = arith.constant 0 : i32
    return %c0_i32, %c0_i32_0, %c0_i32_1 : i32, i32, i32
  }
  func.func @transform_4(%arg0: i32) -> (i32, i32, i32) {
    %c0_i32 = arith.constant 0 : i32
    %c0_i32_0 = arith.constant 0 : i32
    %c0_i32_1 = arith.constant 0 : i32
    %c0_i32_2 = arith.constant 0 : i32
    return %c0_i32, %c0_i32_0, %c0_i32_1 : i32, i32, i32
  }
  func.func @transform_5(%arg0: i32) -> (i32, i32, i32) {
    %c0_i32 = arith.constant 0 : i32
    %c0_i32_0 = arith.constant 0 : i32
    %c0_i32_1 = arith.constant 0 : i32
    return %arg0, %c0_i32, %c0_i32_0 : i32, i32, i32
  }
}

</mosaic_0001>

<bundles_post_ra>
// kernel: tpu_custom_call.1
= control target key start
LH: loop header
LB: loop body
LE: loop exit
PB: predicated region body
PF: predicated region fallthrough
CT: control target
= control target key end

     0   :  { %10 = vsyncpa [#allocation3], 0  ;;  %s4265_s0 = inlined_call_operand.hbm [shape: f32[2,8,64], index: 0, kind: input, shape index: {}]   ;;  %s4266_s1 = inlined_call_operand.hbm [shape: f32[2,64,192], index: 1, kind: input, shape index: {}]   ;;  %s4267_s2 = inlined_call_operand.vmem [shape: f32[2,1,192], index: 2, kind: input, shape index: {}]   ;;  %s4268_s3 = inlined_call_operand.hbm [shape: f32[2,64,64], index: 3, kind: input, shape index: {}]   ;;  %s4269_s4 = inlined_call_operand.vmem [shape: f32[2,1,64], index: 4, kind: input, shape index: {}]   ;;  %s4270_s5 = inlined_call_operand.hbm [shape: f32[2,8,64], index: 5, kind: output, shape index: {}]  }
   0x1   :  { %11 = vsyncpa [#allocation6], 0 }
   0x2   :  { %12 = vsyncpa [#allocation4], 0  ;;  %s3795_s18 = smov [#allocation5]   ;;  %s3701_s22 = scalar_lea.hbm %s4266_s1, 4096 }
   0x3   :  { %s30_s19 = sshll.u32 %s3795_s18, 4  ;;  %p3702_p0 = scmp.ne.s32.totalorder %s4266_s1, %s3701_s22  ;;  %s31_s19 = int_to_ptr.vmem [resolvable:$true] %s30_s19 }
   0x4   :  { %p3705_p1 = scmp.lt.u32.totalorder %s3701_s22, %s4266_s1 }
   0x6   :  { %p3707_p2 = pnand %p3705_p1, %p3702_p0 }
   0x8   :  { %3710 = shalt.err (!%p3707_p2)
}
   0x9   :  { %s3711_s27 = scalar_lea.vmem %s31_s19, 4096  ;;  %p3716_p4 = scmp.lt.s32.totalorder %s31_s19, %s31_s19 }
   0xa   :  { %p3712_p3 = scmp.ne.s32.totalorder %s31_s19, %s3711_s27  ;;  %p3717_p5 = scmp.lt.s32.totalorder %s3711_s27, %s3711_s27 }
   0xc   :  { %p3718_p6 = por %p3717_p5, %p3716_p4 }
   0xe   :  { %p3719_p7 = pnand %p3718_p6, %p3712_p3 }
  0x10   :  { %3722 = shalt.err (!%p3719_p7)
}
  0x11   :  { %s3796_s28 = smov 256   ;;  %s3797_s29 = smov 16  }
  0x12   :  { %36 = dma.hbm_to_vmem [thread:$0]  %s4266_s1, 4096, %s31_s19, [#allocation6], %s3796_s28, %s3796_s28, %s3797_s29  }
  0x13   :  { %s3798_s7 = smov [#allocation2]   ;;  %s3723_s11 = scalar_lea.hbm %s4265_s0, 256 }
  0x14   :  { %s18_s8 = sshll.u32 %s3798_s7, 4  ;;  %p3724_p8 = scmp.ne.s32.totalorder %s4265_s0, %s3723_s11  ;;  %s19_s8 = int_to_ptr.vmem [resolvable:$true] %s18_s8 }
  0x15   :  { %p3727_p9 = scmp.lt.u32.totalorder %s3723_s11, %s4265_s0 }
  0x17   :  { %p3729_p10 = pnand %p3727_p9, %p3724_p8 }
  0x19   :  { %3732 = shalt.err (!%p3729_p10)
}
  0x1a   :  { %s3733_s16 = scalar_lea.vmem %s19_s8, 256  ;;  %p3738_p12 = scmp.lt.s32.totalorder %s19_s8, %s19_s8 }
  0x1b   :  { %p3734_p11 = scmp.ne.s32.totalorder %s19_s8, %s3733_s16  ;;  %p3739_p13 = scmp.lt.s32.totalorder %s3733_s16, %s3733_s16 }
  0x1d   :  { %p3740_p0 = por %p3739_p13, %p3738_p12 }
  0x1f   :  { %p3741_p1 = pnand %p3740_p0, %p3734_p11 }
  0x21   :  { %3744 = shalt.err (!%p3741_p1)
}
  0x22   :  { %s3799_s1 = smov 128   ;;  %s3800_s17 = smov 8  }
  0x23   :  { %24 = dma.hbm_to_vmem [thread:$0]  %s4265_s0, 256, %s19_s8, [#allocation3], %s3799_s1, %s3799_s1, %s3800_s17  }
  0x24   :  { %s3801_s20 = smov [#allocation7]   ;;  %s3745_s24 = scalar_lea.hbm %s4268_s3, 2048 }
  0x25   :  { %s44_s21 = sshll.u32 %s3801_s20, 4  ;;  %p3746_p2 = scmp.ne.s32.totalorder %s4268_s3, %s3745_s24  ;;  %s45_s21 = int_to_ptr.vmem [resolvable:$true] %s44_s21 }
  0x26   :  { %p3749_p3 = scmp.lt.u32.totalorder %s3745_s24, %s4268_s3 }
  0x28   :  { %p3751_p4 = pnand %p3749_p3, %p3746_p2 }
  0x2a   :  { %3754 = shalt.err (!%p3751_p4)
}
  0x2b   :  { %s3755_s30 = scalar_lea.vmem %s45_s21, 2048  ;;  %p3760_p6 = scmp.lt.s32.totalorder %s45_s21, %s45_s21 }
  0x2c   :  { %p3756_p5 = scmp.ne.s32.totalorder %s45_s21, %s3755_s30  ;;  %p3761_p7 = scmp.lt.s32.totalorder %s3755_s30, %s3755_s30 }
  0x2e   :  { %p3762_p8 = por %p3761_p7, %p3760_p6 }
  0x30   :  { %p3763_p9 = pnand %p3762_p8, %p3756_p5 }
  0x32   :  { %3766 = shalt.err (!%p3763_p9)
}
  0x33   :  { %50 = dma.hbm_to_vmem [thread:$0]  %s4268_s3, 2048, %s45_s21, [#allocation6], %s3799_s1, %s3799_s1, %s3800_s17  }
  0x34   :  { %3789 = dma.done.wait [#allocation3], 256  }
  0x35   :  { %3790 = vsyncadd [#allocation3], 4294967040 }
  0x36   :  { %3791 = dma.done.wait [#allocation6], 6144  }
  0x37   :  { %3792 = vsyncadd [#allocation6], 4294961152  ;;  %v3802_v0 = vmov 0.0   ;;  %v65_v1 = vld [vmem:[#allocation5 + $0x8] sm:$0xff]  ;;  %v67_v2 = vld [vmem:[#allocation5 + $0x18] sm:$0xff]  ;;  %vm92_vm0 = vcmask 523264   ;;  %v82_v27 = vlaneseq }
  0x38   :  { %163 = vmatprep.mubr.f32.mxu0 %v3802_v0  ;;  %3359 = vmatprep.subr.mxu1 %v3802_v0  ;;  %v64_v3 = vld [vmem:[#allocation5] sm:$0xff]  ;;  %v3557_v4 = vpack.c.bf16 %v67_v2, %v65_v1  ;;  %v66_v5 = vld [vmem:[#allocation5 + $0x10] sm:$0xff]  ;;  %v69_v6 = vld [vmem:[#allocation5 + $0x28] sm:$0xff]  ;;  %vm3803_vm1 = vmmov 0   ;;  %s3804_s8 = smov 64   ;;  %vm179_vm2 = vcmask 130048  }
  0x39   :  { %v71_v7 = vld [vmem:[#allocation5 + $0x38] sm:$0xff]  ;;  %v3559_v8 = vpack.c.bf16 %v66_v5, %v64_v3  ;;  %v68_v10 = vld [vmem:[#allocation5 + $0x20] sm:$0xff]  ;;  %v70_v11 = vld [vmem:[#allocation5 + $0x30] sm:$0xff]  ;;  %v3890_v28 = vshrl.u32 %v82_v27, 7  ;;  %3361 = vmatprep.mubr.msk.f32.mxu1 %vm3803_vm1, %v3802_v0  ;;  %vm333_vm3 = vcmask 64512   ;;  %s3805_s9 = smov 48  }
  0x3a   :  { %v3561_v9 = vpack.c.bf16 %v71_v7, %v69_v6  ;;  %v73_v12 = vld [vmem:[#allocation5 + $0x48] sm:$0xff]  ;;  %3558 = vmatprep.subr.bf16.mxu0 %v3557_v4  ;;  %v75_v13 = vld [vmem:[#allocation5 + $0x58] sm:$0xff]  ;;  %v3563_v14 = vpack.c.bf16 %v70_v11, %v68_v10  ;;  %v72_v16 = vld [vmem:[#allocation5 + $0x40] sm:$0xff]  ;;  %s3806_s10 = smov 112   ;;  %s3807_s11 = smov 32   ;;  %vm1526_vm4 = vcmask 261120  }
  0x3b   :  { %3560 = vmatpush1.bf16.msra.mxu0 %v3559_v8  ;;  %v3565_v15 = vpack.c.bf16 %v75_v13, %v73_v12  ;;  %v74_v17 = vld [vmem:[#allocation5 + $0x50] sm:$0xff]  ;;  %v77_v18 = vld [vmem:[#allocation5 + $0x68] sm:$0xff]  ;;  %v79_v19 = vld [vmem:[#allocation5 + $0x78] sm:$0xff]  ;;  %v84_v29 = vsub.s32 0, %v3890_v28  ;;  %v88_v33 = vsub.s32 1, %v3890_v28  ;;  %s3808_s12 = smov 96  }
  0x3c   :  { %3562 = vmatprep.subr.bf16.mxu0 %v3561_v9  ;;  %v3567_v20 = vpack.c.bf16 %v74_v17, %v72_v16  ;;  %v3569_v21 = vpack.c.bf16 %v79_v19, %v77_v18  ;;  %v76_v22 = vld [vmem:[#allocation5 + $0x60] sm:$0xff]  ;;  %v78_v23 = vld [vmem:[#allocation5 + $0x70] sm:$0xff]  ;;  %v63_v26 = vld [vmem:[#allocation2 + $0x8] sm:$0xff]  ;;  %s3809_s13 = smov 80   ;;  %vm1529_vm5 = vcmask 392192   ;;  %s3810_s19 = smov [#allocation8]  }
  0x3d   :  { %v3571_v24 = vpack.c.bf16 %v78_v23, %v76_v22  ;;  %v62_v25 = vld [vmem:[#allocation2] sm:$0xff]  ;;  %s3202_s20 = sshll.u32 %s3810_s19, 4  ;;  %s3203_s20 = int_to_ptr.vmem [resolvable:$true] %s3202_s20 }
  0x3e   :  { %v80_v30 = vld [vmem:[%s4267_s2] sm:$0x3]  ;;  %s3767_s21 = scalar_lea.vmem %s3203_s20, 256  ;;  %p3772_p11 = scmp.lt.s32.totalorder %s3203_s20, %s3203_s20 }
  0x3f   :  { %3564 = vmatpush1.bf16.msra.mxu0 %v3563_v14  ;;  %v85_v31 = vrot.slane %v80_v30, %v84_v29  ;;  %v89_v36 = vrot.slane %v80_v30, %v88_v33  ;;  %p3768_p10 = scmp.ne.s32.totalorder %s3203_s20, %s3767_s21  ;;  %p3773_p12 = scmp.lt.s32.totalorder %s3767_s21, %s3767_s21 }
  0x40   :  { %3566 = vmatprep.subr.bf16.mxu0 %v3565_v15 }
  0x41   :  { %p3774_p13 = por %p3773_p12, %p3772_p11 }
  0x43   :  { %3568 = vmatpush1.bf16.msra.mxu0 %v3567_v20  ;;  %p3775_p0 = pnand %p3774_p13, %p3768_p10 }
  0x44   :  { %3570 = vmatprep.subr.bf16.mxu0 %v3569_v21 }
  0x47   :  { %3572 = vmatpush1.bf16.msra.mxu0 %v3571_v24 }
  0x48   :  { %3404 = vmatprep.subr.mxu0 %v3802_v0 }
  0x4a   :  { %3215 = vmatmul.mubr.msk.f32.vlgmr.msra.gmra.mrb[0].mxu0 %vm92_vm0, %v62_v25 }
  0x4b   :  { %169 = vmatprep.mubr.f32.mxu0 %v3802_v0 }
  0x4e   :  { %3216 = vmatmul.mubr.msk.f32.gmra.mrb[2].mxu0 %vm92_vm0, %v63_v26 }
  0x4f   :  { %3406 = vmatprep.mubr.msk.f32.mxu0 %vm3803_vm1, %v3802_v0 }
 0x11d   :  { %v165_v32 = vpop.f32.mrb[0].mxu0 }
 0x11e   :  { %v3903_v34 = vadd.f32 %v165_v32, %v85_v31  ;;  %v167_v35 = vpop.f32.mrb[1].mxu0 }
 0x11f   :  { %v3923_v43 = vadd.f32 %v167_v35, %v89_v36 }
 0x120   :  { %177 = vrot.lane.b32.xlu0 %v3903_v34, %s3804_s8 }
 0x121   :  { %v171_v37 = vpop.f32.mrb[2].mxu0 }
 0x122   :  { %v3909_v38 = vadd.f32 %v171_v37, %v85_v31  ;;  %v173_v39 = vpop.f32.mrb[3].mxu0 }
 0x123   :  { %v3911_v40 = vadd.f32 %v173_v39, %v89_v36 }
 0x124   :  { %255 = vrot.lane.b32.xlu0 %v3909_v38, %s3804_s8 }
 0x192   :  { %v178_v41 = vpop.permute.xlu0 %177 }
 0x193   :  { %3360 = vmatpush3.xpose.msk.msra.mxu1 %vm179_vm2, %v178_v41 }
 0x194   :  { %3364 = vmatprep.subr.mxu1 %v3802_v0 }
 0x196   :  { %3362 = vmatmul.mubr.msk.f32.vlgmr.msra.gmra.mrb[0].mxu1 %vm179_vm2, %v3903_v34  ;;  %v256_v42 = vpop.permute.xlu0 %255 }
 0x197   :  { %3365 = vmatpush3.xpose.msk.msra.mxu1 %vm179_vm2, %v256_v42  ;;  %3366 = vmatprep.mubr.msk.f32.mxu1 %vm3803_vm1, %v3802_v0 }
 0x198   :  { %3369 = vmatprep.subr.mxu1 %v3802_v0 }
 0x19a   :  { %3367 = vmatmul.mubr.msk.f32.vlgmr.msra.gmra.mrb[2].mxu1 %vm179_vm2, %v3909_v38 }
 0x19b   :  { %3370 = vmatpush3.msra.mxu1 %v3923_v43  ;;  %3371 = vmatprep.mubr.msk.f32.mxu1 %vm3803_vm1, %v3802_v0 }
 0x19c   :  { %3374 = vmatprep.subr.mxu1 %v3802_v0 }
 0x269   :  { %v250_v44 = vpop.f32.mrb[0].mxu1 }
 0x26a   :  { %v331_v45 = vmul.f32 0.25, %v250_v44  ;;  %v3363_v46 = vpop.f32.mrb[1].mxu1 }
 0x26c   :  { %v334_v47 = vsel %vm333_vm3, %v331_v45, -inf }
 0x26d   :  { %335 = vmax.xlane.f32.xlu1 %v334_v47  ;;  %v327_v48 = vpop.f32.mrb[2].mxu1 }
 0x26e   :  { %v332_v49 = vmul.f32 0.25, %v327_v48  ;;  %v3368_v50 = vpop.f32.mrb[3].mxu1 }
 0x270   :  { %v337_v51 = vsel %vm333_vm3, %v332_v49, -inf }
 0x271   :  { %338 = vmax.xlane.f32.xlu1 %v337_v51 }
 0x282   :  { %504 = vrot.lane.b32.xlu1 %v3903_v34, %s3805_s9 }
 0x286   :  { %502 = vrot.lane.b32.xlu1 %v3903_v34, %s3806_s10 }
 0x2fa   :  { %v336_v52 = vpop.xlane.xlu1 %335 }
 0x2fb   :  { %v340_v53 = vsub.f32 %v331_v45, %v336_v52 }
 0x2fd   :  { %v342_v54 = vmul.f32 1.442695, %v340_v53 }
 0x2fe   :  { %v339_v55 = vpop.xlane.xlu1 %338 }
 0x2ff   :  { %3637 = vpow2.f32 %v342_v54  ;;  %v341_v56 = vsub.f32 %v332_v49, %v339_v55 }
 0x301   :  { %v344_v57 = vmul.f32 1.442695, %v341_v56 }
 0x302   :  { %v505_v62 = vpop.permute.xlu1 %504 }
 0x303   :  { %3639 = vpow2.f32 %v344_v57 }
 0x306   :  { %v503_v63 = vpop.permute.xlu1 %502 }
 0x309   :  { %v3638_v58 = vpop.eup %3637 }
 0x30a   :  { %v346_v59 = vsel %vm333_vm3, %v3638_v58, 0.0 }
 0x30b   :  { %347 = vadd.xlane.f32.xlu0 %v346_v59 }
 0x30d   :  { %v3640_v60 = vpop.eup %3639 }
 0x30e   :  { %v349_v61 = vsel %vm333_vm3, %v3640_v60, 0.0 }
 0x30f   :  { %350 = vadd.xlane.f32.xlu1 %v349_v61 }
 0x320   :  { %582 = vrot.lane.b32.xlu1 %v3909_v38, %s3805_s9 }
 0x324   :  { %580 = vrot.lane.b32.xlu1 %v3909_v38, %s3806_s10 }
 0x398   :  { %v348_v1 = vpop.xlane.xlu0 %347 }
 0x399   :  { %3641 = vrcp.f32 %v348_v1 }
 0x39c   :  { %v351_v2 = vpop.xlane.xlu1 %350 }
 0x39d   :  { %3643 = vrcp.f32 %v351_v2 }
 0x3a0   :  { %v583_v7 = vpop.permute.xlu1 %582 }
 0x3a3   :  { %v3642_v3 = vpop.eup %3641 }
 0x3a4   :  { %v354_v4 = vmul.f32 %v3642_v3, %v3638_v58  ;;  %v581_v8 = vpop.permute.xlu1 %580 }
 0x3a6   :  { %3372 = vmatmul.mubr.msk.f32.vlgmr.msra.gmra.mrb[4].mxu1 %vm333_vm3, %v354_v4 }
 0x3a7   :  { %v3644_v5 = vpop.eup %3643  ;;  %3375 = vmatpush3.msra.mxu1 %v3911_v40  ;;  %3376 = vmatprep.mubr.msk.f32.mxu1 %vm3803_vm1, %v3802_v0 }
 0x3a8   :  { %v355_v6 = vmul.f32 %v3644_v5, %v3640_v60  ;;  %3379 = vmatprep.subr.mxu1 %v3802_v0 }
 0x3aa   :  { %3377 = vmatmul.mubr.msk.f32.vlgmr.msra.gmra.mrb[6].mxu1 %vm333_vm3, %v355_v6 }
 0x3ab   :  { %3381 = vmatprep.mubr.msk.f32.mxu1 %vm3803_vm1, %v3802_v0 }
 0x3ae   :  { %3380 = vmatpush3.xpose.msk.msra.mxu1 %vm179_vm2, %v505_v62 }
 0x3af   :  { %3384 = vmatprep.subr.mxu1 %v3802_v0 }
 0x3b1   :  { %3382 = vmatmul.mubr.msk.f32.vlgmr.msra.gmra.mrb[8].mxu1 %vm179_vm2, %v503_v63 }
 0x3b2   :  { %3385 = vmatpush3.xpose.msk.msra.mxu1 %vm179_vm2, %v583_v7  ;;  %3386 = vmatprep.mubr.msk.f32.mxu1 %vm3803_vm1, %v3802_v0 }
 0x3b3   :  { %3389 = vmatprep.subr.mxu1 %v3802_v0 }
 0x3b5   :  { %3387 = vmatmul.mubr.msk.f32.vlgmr.msra.gmra.mrb[10].mxu1 %vm179_vm2, %v581_v8 }
 0x3b6   :  { %3391 = vmatprep.mubr.msk.f32.mxu1 %vm3803_vm1, %v3802_v0 }
 0x479   :  { %v3961_v9 = vpop.f32.mrb[4].mxu1 }
 0x47a   :  { %v3373_v10 = vpop.f32.mrb[5].mxu1 }
 0x47d   :  { %v3963_v11 = vpop.f32.mrb[6].mxu1 }
 0x47e   :  { %v3378_v12 = vpop.f32.mrb[7].mxu1 }
 0x484   :  { %v576_v13 = vpop.f32.mrb[8].mxu1 }
 0x485   :  { %v658_v14 = vmul.f32 0.25, %v576_v13  ;;  %v3383_v15 = vpop.f32.mrb[9].mxu1 }
 0x487   :  { %v660_v16 = vsel %vm333_vm3, %v658_v14, -inf }
 0x488   :  { %661 = vmax.xlane.f32.xlu0 %v660_v16  ;;  %v654_v17 = vpop.f32.mrb[10].mxu1 }
 0x489   :  { %v659_v18 = vmul.f32 0.25, %v654_v17  ;;  %v3388_v19 = vpop.f32.mrb[11].mxu1 }
 0x48b   :  { %v663_v20 = vsel %vm333_vm3, %v659_v18, -inf }
 0x48c   :  { %664 = vmax.xlane.f32.xlu1 %v663_v20 }
 0x49d   :  { %916 = vrot.lane.b32.xlu1 %v3909_v38, %s3807_s11 }
 0x49e   :  { %683 = vrot.lane.b32.xlu0 %v3923_v43, %s3806_s10 }
 0x4a2   :  { %760 = vrot.lane.b32.xlu0 %v3911_v40, %s3806_s10 }
 0x4a6   :  { %838 = vrot.lane.b32.xlu0 %v3903_v34, %s3807_s11 }
 0x515   :  { %v662_v21 = vpop.xlane.xlu0 %661 }
 0x516   :  { %v666_v22 = vsub.f32 %v658_v14, %v662_v21 }
 0x518   :  { %v668_v23 = vmul.f32 1.442695, %v666_v22 }
 0x519   :  { %v684_v24 = vpop.permute.xlu0 %683  ;;  %v665_v25 = vpop.xlane.xlu1 %664 }
 0x51a   :  { %3645 = vpow2.f32 %v668_v23  ;;  %v667_v26 = vsub.f32 %v659_v18, %v665_v25  ;;  %3390 = vmatpush3.msra.mxu1 %v684_v24 }
 0x51b   :  { %3394 = vmatprep.subr.mxu1 %v3802_v0 }
 0x51c   :  { %v670_v27 = vmul.f32 1.442695, %v667_v26 }
 0x51d   :  { %v917_v30 = vpop.permute.xlu1 %916  ;;  %v761_v37 = vpop.permute.xlu0 %760 }
 0x51e   :  { %3647 = vpow2.f32 %v670_v27  ;;  %3405 = vmatpush3.xpose.msk.msra.mxu0 %vm179_vm2, %v917_v30 }
 0x51f   :  { %3414 = vmatprep.subr.mxu0 %v3802_v0 }
 0x521   :  { %v839_v39 = vpop.permute.xlu0 %838 }
 0x524   :  { %v3646_v31 = vpop.eup %3645 }
 0x525   :  { %v672_v32 = vsel %vm333_vm3, %v3646_v31, 0.0 }
 0x526   :  { %673 = vadd.xlane.f32.xlu0 %v672_v32 }
 0x528   :  { %v3648_v35 = vpop.eup %3647 }
 0x529   :  { %v675_v36 = vsel %vm333_vm3, %v3648_v35, 0.0 }
 0x52a   :  { %676 = vadd.xlane.f32.xlu0 %v675_v36 }
 0x540   :  { %836 = vrot.lane.b32.xlu0 %v3903_v34, %s3808_s12 }
 0x544   :  { %914 = vrot.lane.b32.xlu0 %v3909_v38, %s3808_s12 }
 0x5b3   :  { %v674_v41 = vpop.xlane.xlu0 %673 }
 0x5b4   :  { %3649 = vrcp.f32 %v674_v41 }
 0x5b7   :  { %v677_v42 = vpop.xlane.xlu0 %676 }
 0x5b8   :  { %3651 = vrcp.f32 %v677_v42 }
 0x5bb   :  { %v837_v44 = vpop.permute.xlu0 %836 }
 0x5be   :  { %v3650_v45 = vpop.eup %3649 }
 0x5bf   :  { %v680_v46 = vmul.f32 %v3650_v45, %v3646_v31  ;;  %v915_v47 = vpop.permute.xlu0 %914 }
 0x5c0   :  { %3407 = vmatmul.mubr.msk.f32.vlgmr.msra.gmra.mrb[4].mxu0 %vm179_vm2, %v915_v47 }
 0x5c1   :  { %3392 = vmatmul.mubr.msk.f32.vlgmr.msra.gmra.mrb[12].mxu1 %vm333_vm3, %v680_v46  ;;  %3416 = vmatprep.mubr.msk.f32.mxu0 %vm3803_vm1, %v3802_v0 }
 0x5c2   :  { %v3652_v48 = vpop.eup %3651  ;;  %3395 = vmatpush3.msra.mxu1 %v761_v37  ;;  %3396 = vmatprep.mubr.msk.f32.mxu1 %vm3803_vm1, %v3802_v0 }
 0x5c3   :  { %v681_v49 = vmul.f32 %v3652_v48, %v3648_v35  ;;  %3399 = vmatprep.subr.mxu1 %v3802_v0 }
 0x5c5   :  { %3397 = vmatmul.mubr.msk.f32.vlgmr.msra.gmra.mrb[14].mxu1 %vm333_vm3, %v681_v49 }
 0x5c6   :  { %3401 = vmatprep.mubr.msk.f32.mxu1 %vm3803_vm1, %v3802_v0 }
 0x5c9   :  { %3400 = vmatpush3.xpose.msk.msra.mxu1 %vm179_vm2, %v839_v39 }
 0x5ca   :  { %3409 = vmatprep.subr.mxu1 %v3802_v0 }
 0x5cc   :  { %3402 = vmatmul.mubr.msk.f32.vlgmr.msra.gmra.mrb[16].mxu1 %vm179_vm2, %v837_v44 }
 0x5cd   :  { %3411 = vmatprep.mubr.msk.f32.mxu1 %vm3803_vm1, %v3802_v0 }
 0x693   :  { %v988_v50 = vpop.f32.mrb[4].mxu0 }
 0x694   :  { %v993_v51 = vmul.f32 0.25, %v988_v50  ;;  %v3999_v52 = vpop.f32.mrb[12].mxu1  ;;  %v3408_v53 = vpop.f32.mrb[5].mxu0 }
 0x695   :  { %v3393_v54 = vpop.f32.mrb[13].mxu1 }
 0x696   :  { %v997_v55 = vsel %vm333_vm3, %v993_v51, -inf }
 0x697   :  { %998 = vmax.xlane.f32.xlu1 %v997_v55 }
 0x698   :  { %v4002_v56 = vpop.f32.mrb[14].mxu1 }
 0x699   :  { %v3398_v57 = vpop.f32.mrb[15].mxu1 }
 0x69a   :  { %v1533_v57 = vld [vmem:[#allocation7 + $0x8] sm:$0xff] }
 0x69f   :  { %v910_v58 = vpop.f32.mrb[16].mxu1 }
 0x6a0   :  { %v992_v59 = vmul.f32 0.25, %v910_v58  ;;  %v3403_v60 = vpop.f32.mrb[17].mxu1  ;;  %v1534_v58 = vld [vmem:[#allocation7 + $0x10] sm:$0xff] }
 0x6a1   :  { %v1535_v60 = vld [vmem:[#allocation7 + $0x18] sm:$0xff] }
 0x6a2   :  { %v994_v61 = vsel %vm333_vm3, %v992_v59, -inf }
 0x6a3   :  { %995 = vmax.xlane.f32.xlu0 %v994_v61  ;;  %v3577_v61 = vpack.c.bf16 %v1535_v60, %v1534_v58 }
 0x6a8   :  { %1092 = vrot.lane.b32.xlu1 %v3911_v40, %s3808_s12 }
 0x6ac   :  { %1170 = vrot.lane.b32.xlu1 %v3903_v34, %s3797_s29 }
 0x6b0   :  { %1168 = vrot.lane.b32.xlu1 %v3903_v34, %s3809_s13 }
 0x724   :  { %v999_v62 = vpop.xlane.xlu1 %998 }
 0x725   :  { %v1001_v63 = vsub.f32 %v993_v51, %v999_v62  ;;  %v1536_v62 = vld [vmem:[#allocation7 + $0x20] sm:$0xff] }
 0x727   :  { %v1004_v1 = vmul.f32 1.442695, %v1001_v63  ;;  %v1537_v63 = vld [vmem:[#allocation7 + $0x28] sm:$0xff] }
 0x728   :  { %v1093_v2 = vpop.permute.xlu1 %1092 }
 0x729   :  { %3653 = vpow2.f32 %v1004_v1  ;;  %3415 = vmatpush3.msra.mxu0 %v1093_v2  ;;  %v1538_v1 = vld [vmem:[#allocation7 + $0x30] sm:$0xff]  ;;  %v3581_v2 = vpack.c.bf16 %v1537_v63, %v1536_v62 }
 0x72a   :  { %3424 = vmatprep.subr.mxu0 %v3802_v0 }
 0x72c   :  { %v1171_v18 = vpop.permute.xlu1 %1170 }
 0x730   :  { %v996_v5 = vpop.xlane.xlu0 %995  ;;  %v1169_v20 = vpop.permute.xlu1 %1168 }
 0x731   :  { %v1000_v6 = vsub.f32 %v992_v59, %v996_v5  ;;  %v1632_v5 = vld [vmem:[#allocation5 + $0x88] sm:$0xff] }
 0x733   :  { %v3654_v3 = vpop.eup %3653  ;;  %v1002_v7 = vmul.f32 1.442695, %v1000_v6  ;;  %v1634_v6 = vld [vmem:[#allocation5 + $0x98] sm:$0xff] }
 0x734   :  { %v1009_v4 = vsel %vm333_vm3, %v3654_v3, 0.0 }
 0x735   :  { %1010 = vadd.xlane.f32.xlu0 %v1009_v4  ;;  %3655 = vpow2.f32 %v1002_v7  ;;  %v1631_v7 = vld [vmem:[#allocation5 + $0x80] sm:$0xff] }
 0x73f   :  { %v3656_v34 = vpop.eup %3655 }
 0x740   :  { %v1006_v8 = vsel %vm333_vm3, %v3656_v34, 0.0 }
 0x74b   :  { %1016 = vrot.lane.b32.xlu0 %v3923_v43, %s3808_s12 }
 0x76a   :  { %1007 = vadd.xlane.f32.xlu0 %v1006_v8  ;;  %v3589_v8 = vpack.c.bf16 %v1634_v6, %v1632_v5 }
 0x780   :  { %1248 = vrot.lane.b32.xlu0 %v3909_v38, %s3797_s29 }
 0x784   :  { %1246 = vrot.lane.b32.xlu0 %v3909_v38, %s3809_s13 }
 0x7c2   :  { %v1011_v10 = vpop.xlane.xlu0 %1010 }
 0x7c3   :  { %3657 = vrcp.f32 %v1011_v10  ;;  %v1633_v10 = vld [vmem:[#allocation5 + $0x90] sm:$0xff] }
 0x7c6   :  { %v1017_v12 = vpop.permute.xlu0 %1016 }
 0x7c7   :  { %3410 = vmatpush3.msra.mxu1 %v1017_v12  ;;  %v1636_v12 = vld [vmem:[#allocation5 + $0xa8] sm:$0xff] }
 0x7c8   :  { %3419 = vmatprep.subr.mxu1 %v3802_v0 }
 0x7cd   :  { %v3658_v13 = vpop.eup %3657 }
 0x7ce   :  { %v1015_v14 = vmul.f32 %v3658_v13, %v3654_v3  ;;  %v1539_v3 = vld [vmem:[#allocation7 + $0x38] sm:$0xff] }
 0x7cf   :  { %v3585_v4 = vpack.c.bf16 %v1539_v3, %v1538_v1  ;;  %v1638_v13 = vld [vmem:[#allocation5 + $0xb8] sm:$0xff] }
 0x7d0   :  { %3417 = vmatmul.mubr.msk.f32.vlgmr.msra.gmra.mrb[6].mxu0 %vm333_vm3, %v1015_v14 }
 0x7d1   :  { %3426 = vmatprep.mubr.msk.f32.mxu0 %vm3803_vm1, %v3802_v0 }
 0x7f7   :  { %v1008_v15 = vpop.xlane.xlu0 %1007 }
 0x7f8   :  { %3659 = vrcp.f32 %v1008_v15  ;;  %v3591_v15 = vpack.c.bf16 %v1633_v10, %v1631_v7 }
 0x7fb   :  { %v1249_v16 = vpop.permute.xlu0 %1248 }
 0x7fc   :  { %3425 = vmatpush3.xpose.msk.msra.mxu0 %vm179_vm2, %v1249_v16  ;;  %v3593_v16 = vpack.c.bf16 %v1638_v13, %v1636_v12 }
 0x7fd   :  { %3434 = vmatprep.subr.mxu0 %v3802_v0 }
 0x7ff   :  { %v1247_v38 = vpop.permute.xlu0 %1246 }
 0x800   :  { %3427 = vmatmul.mubr.msk.f32.vlgmr.msra.gmra.mrb[8].mxu0 %vm179_vm2, %v1247_v38  ;;  %v1635_v38 = vld [vmem:[#allocation5 + $0xa0] sm:$0xff] }
 0x801   :  { %3436 = vmatprep.mubr.msk.f32.mxu0 %vm3803_vm1, %v3802_v0 }
 0x802   :  { %v3660_v17 = vpop.eup %3659 }
 0x803   :  { %v1014_v19 = vmul.f32 %v3660_v17, %v3656_v34  ;;  %v1637_v17 = vld [vmem:[#allocation5 + $0xb0] sm:$0xff] }
 0x805   :  { %3412 = vmatmul.mubr.msk.f32.vlgmr.msra.gmra.mrb[18].mxu1 %vm333_vm3, %v1014_v19  ;;  %v1642_v19 = vld [vmem:[#allocation5 + $0xd8] sm:$0xff] }
 0x806   :  { %3420 = vmatpush3.xpose.msk.msra.mxu1 %vm179_vm2, %v1171_v18  ;;  %3421 = vmatprep.mubr.msk.f32.mxu1 %vm3803_vm1, %v3802_v0  ;;  %v1640_v18 = vld [vmem:[#allocation5 + $0xc8] sm:$0xff] }
 0x807   :  { %3429 = vmatprep.subr.mxu1 %v3802_v0 }
 0x809   :  { %3422 = vmatmul.mubr.msk.f32.vlgmr.msra.gmra.mrb[20].mxu1 %vm179_vm2, %v1169_v20  ;;  %v3595_v20 = vpack.c.bf16 %v1637_v17, %v1635_v38 }
 0x80a   :  { %3431 = vmatprep.mubr.msk.f32.mxu1 %vm3803_vm1, %v3802_v0 }
 0x8a3   :  { %v1164_v21 = vpop.f32.mrb[6].mxu0 }
 0x8a4   :  { %v3418_v22 = vpop.f32.mrb[7].mxu0 }
 0x8a5   :  { %v1639_v22 = vld [vmem:[#allocation5 + $0xc0] sm:$0xff] }
 0x8d3   :  { %v1320_v23 = vpop.f32.mrb[8].mxu0 }
 0x8d4   :  { %v1325_v24 = vmul.f32 0.25, %v1320_v23  ;;  %v3428_v25 = vpop.f32.mrb[9].mxu0  ;;  %v1641_v23 = vld [vmem:[#allocation5 + $0xd0] sm:$0xff] }
 0x8d6   :  { %v1329_v26 = vsel %vm333_vm3, %v1325_v24, -inf }
 0x8d7   :  { %1330 = vmax.xlane.f32.xlu0 %v1329_v26 }
 0x8d8   :  { %v1088_v27 = vpop.f32.mrb[18].mxu1 }
 0x8d9   :  { %v3413_v30 = vpop.f32.mrb[19].mxu1 }
 0x8dc   :  { %v1242_v31 = vpop.f32.mrb[20].mxu1 }
 0x8dd   :  { %v1324_v32 = vmul.f32 0.25, %v1242_v31  ;;  %v3423_v35 = vpop.f32.mrb[21].mxu1 }
 0x8df   :  { %v1326_v36 = vsel %vm333_vm3, %v1324_v32, -inf }
 0x8e0   :  { %1327 = vmax.xlane.f32.xlu1 %v1326_v36 }
 0x964   :  { %v1331_v37 = vpop.xlane.xlu0 %1330 }
 0x965   :  { %v1333_v39 = vsub.f32 %v1325_v24, %v1331_v37  ;;  %v3599_v24 = vpack.c.bf16 %v1641_v23, %v1639_v22 }
 0x967   :  { %v1336_v41 = vmul.f32 1.442695, %v1333_v39 }
 0x969   :  { %3661 = vpow2.f32 %v1336_v41 }
 0x96d   :  { %v1328_v42 = vpop.xlane.xlu1 %1327 }
 0x96e   :  { %v1332_v44 = vsub.f32 %v1324_v32, %v1328_v42 }
 0x970   :  { %v1334_v45 = vmul.f32 1.442695, %v1332_v44 }
 0x972   :  { %3663 = vpow2.f32 %v1334_v45 }
 0x973   :  { %v3662_v46 = vpop.eup %3661 }
 0x974   :  { %v1341_v47 = vsel %vm333_vm3, %v3662_v46, 0.0 }
 0x975   :  { %1342 = vadd.xlane.f32.xlu1 %v1341_v47 }
 0x97c   :  { %v3664_v48 = vpop.eup %3663 }
 0x97d   :  { %v1338_v49 = vsel %vm333_vm3, %v3664_v48, 0.0 }
 0x97e   :  { %1339 = vadd.xlane.f32.xlu0 %v1338_v49  ;;  %v1645_v49 = vld [vmem:[#allocation5 + $0xf0] sm:$0xff] }
 0x986   :  { %1424 = vrot.lane.b32.xlu1 %v3911_v40, %s3809_s13 }
 0x98a   :  { %1502 = vrot.lane.b32.xlu1 %v3999_v52, %s3797_s29 }
 0x98e   :  { %1510 = vrot.lane.b32.xlu1 %v1088_v27, %s3807_s11 }
 0x994   :  { %1348 = vrot.lane.b32.xlu0 %v3923_v43, %s3809_s13 }
 0x998   :  { %1504 = vrot.lane.b32.xlu0 %v4002_v56, %s3797_s29  ;;  %v1532_v56 = vld [vmem:[#allocation7] sm:$0xff] }
 0x999   :  { %v3573_v59 = vpack.c.bf16 %v1533_v57, %v1532_v56 }
 0x99c   :  { %1512 = vrot.lane.b32.xlu0 %v1164_v21, %s3807_s11  ;;  %v3597_v21 = vpack.c.bf16 %v1642_v19, %v1640_v18 }
 0xa02   :  { %v1343_v50 = vpop.xlane.xlu1 %1342 }
 0xa03   :  { %3665 = vrcp.f32 %v1343_v50  ;;  %v3241_v50 = vld [vmem:[%s4269_s4] ss:$0 sm:$0xff] }
 0xa06   :  { %v1425_v51 = vpop.permute.xlu1 %1424 }
 0xa07   :  { %3435 = vmatpush3.msra.mxu0 %v1425_v51 }
 0xa08   :  { %3590 = vmatprep.subr.bf16.mxu0 %v3589_v8 }
 0xa0a   :  { %v1503_v30 = vpop.permute.xlu1 %1502 }
 0xa0b   :  { %v1340_v53 = vpop.xlane.xlu0 %1339  ;;  %v1524_v35 = vsel %vm179_vm2, %v3961_v9, %v1503_v30  ;;  %v1644_v9 = vld [vmem:[#allocation5 + $0xe8] sm:$0xff] }
 0xa0c   :  { %3667 = vrcp.f32 %v1340_v53 }
 0xa0d   :  { %v3666_v40 = vpop.eup %3665 }
 0xa0e   :  { %v1347_v54 = vmul.f32 %v3666_v40, %v3662_v46  ;;  %v1511_v32 = vpop.permute.xlu1 %1510  ;;  %v1646_v46 = vld [vmem:[#allocation5 + $0xf8] sm:$0xff] }
 0xa0f   :  { %v1349_v55 = vpop.permute.xlu0 %1348  ;;  %v1527_v37 = vsel %vm1526_vm4, %v1524_v35, %v1511_v32  ;;  %v3601_v47 = vpack.c.bf16 %v1646_v46, %v1644_v9 }
 0xa10   :  { %3430 = vmatpush3.msra.mxu1 %v1349_v55  ;;  %3437 = vmatmul.mubr.msk.f32.vlgmr.msra.gmra.mrb[10].mxu0 %vm333_vm3, %v1347_v54 }
 0xa11   :  { %1730 = vmatprep.mubr.f32.mxu0 %v3802_v0  ;;  %3574 = vmatprep.subr.bf16.mxu1 %v3573_v59 }
 0xa12   :  { %3592 = vmatpush1.bf16.msra.mxu0 %v3591_v15 }
 0xa13   :  { %3594 = vmatprep.subr.bf16.mxu0 %v3593_v16  ;;  %v1505_v27 = vpop.permute.xlu0 %1504 }
 0xa14   :  { %v1525_v39 = vsel %vm179_vm2, %v3963_v11, %v1505_v27 }
 0xa16   :  { %v3668_v43 = vpop.eup %3667  ;;  %3596 = vmatpush1.bf16.msra.mxu0 %v3595_v20 }
 0xa17   :  { %v1346_v52 = vmul.f32 %v3668_v43, %v3664_v48  ;;  %3598 = vmatprep.subr.bf16.mxu0 %v3597_v21  ;;  %v1513_v31 = vpop.permute.xlu0 %1512  ;;  %v1643_v48 = vld [vmem:[#allocation5 + $0xe0] sm:$0xff] }
 0xa18   :  { %v1528_v42 = vsel %vm1526_vm4, %v1525_v39, %v1513_v31  ;;  %v3603_v11 = vpack.c.bf16 %v1645_v49, %v1643_v48 }
 0xa19   :  { %3432 = vmatmul.mubr.msk.f32.vlgmr.msra.gmra.mrb[22].mxu1 %vm333_vm3, %v1346_v52  ;;  %v3244_v52 = vld [vmem:[%s4267_s2 + $0x2] sm:$0x3] }
 0xa1a   :  { %3576 = vmatpush3.bf16.msra.mxu1 %v3573_v59  ;;  %3600 = vmatpush1.bf16.msra.mxu0 %v3599_v24  ;;  %v1653_v56 = vrot.slane %v3244_v52, %v84_v29  ;;  %v1657_v57 = vrot.slane %v3244_v52, %v88_v33 }
 0xa1b   :  { %3578 = vmatprep.subr.bf16.mxu1 %v3577_v61  ;;  %3602 = vmatprep.subr.bf16.mxu0 %v3601_v47 }
 0xa1e   :  { %3580 = vmatpush3.bf16.msra.mxu1 %v3577_v61  ;;  %3604 = vmatpush1.bf16.msra.mxu0 %v3603_v11 }
 0xa1f   :  { %3582 = vmatprep.subr.bf16.mxu1 %v3581_v2  ;;  %3468 = vmatprep.subr.mxu0 %v3802_v0 }
 0xa22   :  { %3584 = vmatpush3.bf16.msra.mxu1 %v3581_v2 }
 0xa23   :  { %3586 = vmatprep.subr.bf16.mxu1 %v3585_v4 }
 0xa26   :  { %3588 = vmatpush3.bf16.msra.mxu1 %v3585_v4 }
 0xa27   :  { %3458 = vmatprep.subr.mxu1 %v3802_v0 }
 0xae3   :  { %v1496_v34 = vpop.f32.mrb[10].mxu0 }
 0xae4   :  { %1520 = vrot.lane.b32.xlu0 %v1496_v34, %s3805_s9  ;;  %v3438_v14 = vpop.f32.mrb[11].mxu0 }
 0xaec   :  { %v1420_v25 = vpop.f32.mrb[22].mxu1 }
 0xaed   :  { %1518 = vrot.lane.b32.xlu1 %v1420_v25, %s3805_s9  ;;  %v3433_v26 = vpop.f32.mrb[23].mxu1 }
 0xb56   :  { %v1521_v36 = vpop.permute.xlu0 %1520 }
 0xb57   :  { %v1531_v45 = vsel %vm1529_vm5, %v1528_v42, %v1521_v36 }
 0xb5f   :  { %v1519_v41 = vpop.permute.xlu1 %1518 }
 0xb60   :  { %v1530_v44 = vsel %vm1529_vm5, %v1527_v37, %v1519_v41 }
 0xb61   :  { %3455 = vmatprep.mubr.msk.f32.mxu1 %vm92_vm0, %v1530_v44 }
 0xb62   :  { %3456 = vmatmul.mubr.msk.f32.vlgmr.msra.gmra.mrb[24].mxu1 %vm92_vm0, %v1531_v45 }
 0xb63   :  { %3460 = vmatprep.mubr.msk.f32.mxu1 %vm3803_vm1, %v3802_v0 }
 0xc35   :  { %v3457_v51 = vpop.f32.mrb[24].mxu1 }
 0xc36   :  { %v1619_v53 = vpop.f32.mrb[25].mxu1  ;;  %v1625_v54 = vadd.f32 %v3457_v51, %v3241_v50 }
 0xc37   :  { %v1620_v40 = vadd.f32 %v3241_v50, %v1619_v53 }
 0xc38   :  { %v1629_v43 = vmax.f32 %v1625_v54, 0.0 }
 0xc39   :  { %v1628_v55 = vmax.f32 %v1620_v40, 0.0 }
 0xc3b   :  { %3245 = vmatmul.mubr.msk.f32.vlgmr.msra.gmra.mrb[12].mxu0 %vm92_vm0, %v1628_v55 }
 0xc3c   :  { %1736 = vmatprep.mubr.f32.mxu0 %v3802_v0 }
 0xc3f   :  { %3246 = vmatmul.mubr.msk.f32.gmra.mrb[14].mxu0 %vm92_vm0, %v1629_v43 }
 0xc40   :  { %3470 = vmatprep.mubr.msk.f32.mxu0 %vm3803_vm1, %v3802_v0 }
 0xd0e   :  { %v1732_v58 = vpop.f32.mrb[12].mxu0 }
 0xd0f   :  { %v4085_v59 = vadd.f32 %v1732_v58, %v1653_v56  ;;  %v1734_v60 = vpop.f32.mrb[13].mxu0 }
 0xd10   :  { %v4087_v61 = vadd.f32 %v1734_v60, %v1657_v57 }
 0xd11   :  { %1744 = vrot.lane.b32.xlu1 %v4085_v59, %s3804_s8 }
 0xd12   :  { %v1738_v62 = vpop.f32.mrb[14].mxu0  ;;  %3469 = vmatpush3.msra.mxu0 %v4087_v61 }
 0xd13   :  { %v4092_v63 = vadd.f32 %v1738_v62, %v1653_v56  ;;  %v1740_v1 = vpop.f32.mrb[15].mxu0  ;;  %3478 = vmatprep.subr.mxu0 %v3802_v0 }
 0xd14   :  { %v4095_v29 = vadd.f32 %v1740_v1, %v1657_v57 }
 0xd15   :  { %1821 = vrot.lane.b32.xlu0 %v4092_v63, %s3804_s8 }
 0xd83   :  { %v1745_v28 = vpop.permute.xlu1 %1744 }
 0xd84   :  { %3459 = vmatpush3.xpose.msk.msra.mxu1 %vm179_vm2, %v1745_v28 }
 0xd85   :  { %3463 = vmatprep.subr.mxu1 %v3802_v0 }
 0xd87   :  { %v1822_v33 = vpop.permute.xlu0 %1821  ;;  %3461 = vmatmul.mubr.msk.f32.vlgmr.msra.gmra.mrb[26].mxu1 %vm179_vm2, %v4085_v59 }
 0xd88   :  { %3464 = vmatpush3.xpose.msk.msra.mxu1 %vm179_vm2, %v1822_v33  ;;  %3465 = vmatprep.mubr.msk.f32.mxu1 %vm3803_vm1, %v3802_v0 }
 0xd89   :  { %3473 = vmatprep.subr.mxu1 %v3802_v0 }
 0xd8b   :  { %3466 = vmatmul.mubr.msk.f32.vlgmr.msra.gmra.mrb[28].mxu1 %vm179_vm2, %v4092_v63 }
 0xd8c   :  { %3474 = vmatpush3.msra.mxu1 %v4095_v29  ;;  %3475 = vmatprep.mubr.msk.f32.mxu1 %vm3803_vm1, %v3802_v0 }
 0xd8d   :  { %3483 = vmatprep.subr.mxu1 %v3802_v0 }
 0xe5a   :  { %v1816_v2 = vpop.f32.mrb[26].mxu1 }
 0xe5b   :  { %v1897_v3 = vmul.f32 0.25, %v1816_v2  ;;  %v3462_v4 = vpop.f32.mrb[27].mxu1 }
 0xe5d   :  { %v1899_v5 = vsel %vm333_vm3, %v1897_v3, -inf }
 0xe5e   :  { %1900 = vmax.xlane.f32.xlu1 %v1899_v5  ;;  %v1893_v6 = vpop.f32.mrb[28].mxu1 }
 0xe5f   :  { %v1898_v7 = vmul.f32 0.25, %v1893_v6  ;;  %v3467_v34 = vpop.f32.mrb[29].mxu1 }
 0xe61   :  { %v1902_v8 = vsel %vm333_vm3, %v1898_v7, -inf }
 0xe62   :  { %1903 = vmax.xlane.f32.xlu0 %v1902_v8 }
 0xe6f   :  { %2147 = vrot.lane.b32.xlu1 %v4092_v63, %s3805_s9 }
 0xeeb   :  { %v1901_v10 = vpop.xlane.xlu1 %1900 }
 0xeec   :  { %v1905_v12 = vsub.f32 %v1897_v3, %v1901_v10 }
 0xeee   :  { %v1907_v13 = vmul.f32 1.442695, %v1905_v12 }
 0xeef   :  { %v1904_v14 = vpop.xlane.xlu0 %1903  ;;  %v2148_v20 = vpop.permute.xlu1 %2147 }
 0xef0   :  { %3669 = vpow2.f32 %v1907_v13  ;;  %v1906_v15 = vsub.f32 %v1898_v7, %v1904_v14 }
 0xef2   :  { %v1909_v16 = vmul.f32 1.442695, %v1906_v15 }
 0xef4   :  { %3671 = vpow2.f32 %v1909_v16 }
 0xefa   :  { %v3670_v38 = vpop.eup %3669 }
 0xefb   :  { %v1911_v17 = vsel %vm333_vm3, %v3670_v38, 0.0 }
 0xefc   :  { %1912 = vadd.xlane.f32.xlu0 %v1911_v17 }
 0xefe   :  { %v3672_v18 = vpop.eup %3671 }
 0xeff   :  { %v1914_v19 = vsel %vm333_vm3, %v3672_v18, 0.0 }
 0xf00   :  { %1915 = vadd.xlane.f32.xlu1 %v1914_v19 }
 0xf11   :  { %2067 = vrot.lane.b32.xlu1 %v4085_v59, %s3806_s10 }
 0xf12   :  { %2069 = vrot.lane.b32.xlu0 %v4085_v59, %s3805_s9 }
 0xf16   :  { %2145 = vrot.lane.b32.xlu0 %v4092_v63, %s3806_s10 }
 0xf89   :  { %v1913_v21 = vpop.xlane.xlu0 %1912 }
 0xf8a   :  { %3673 = vrcp.f32 %v1913_v21 }
 0xf8d   :  { %v1916_v22 = vpop.xlane.xlu1 %1915  ;;  %v2070_v25 = vpop.permute.xlu0 %2069 }
 0xf8e   :  { %3675 = vrcp.f32 %v1916_v22 }
 0xf91   :  { %v2068_v30 = vpop.permute.xlu1 %2067  ;;  %v2146_v31 = vpop.permute.xlu0 %2145 }
 0xf94   :  { %v3674_v23 = vpop.eup %3673 }
 0xf95   :  { %v1919_v24 = vmul.f32 %v3674_v23, %v3670_v38 }
 0xf97   :  { %3471 = vmatmul.mubr.msk.f32.vlgmr.msra.gmra.mrb[16].mxu0 %vm333_vm3, %v1919_v24 }
 0xf98   :  { %v3676_v26 = vpop.eup %3675  ;;  %3479 = vmatpush3.xpose.msk.msra.mxu0 %vm179_vm2, %v2070_v25  ;;  %3480 = vmatprep.mubr.msk.f32.mxu0 %vm3803_vm1, %v3802_v0 }
 0xf99   :  { %v1920_v27 = vmul.f32 %v3676_v26, %v3672_v18  ;;  %3488 = vmatprep.subr.mxu0 %v3802_v0 }
 0xf9b   :  { %3476 = vmatmul.mubr.msk.f32.vlgmr.msra.gmra.mrb[30].mxu1 %vm333_vm3, %v1920_v27  ;;  %3481 = vmatmul.mubr.msk.f32.vlgmr.msra.gmra.mrb[18].mxu0 %vm179_vm2, %v2068_v30 }
 0xf9c   :  { %3484 = vmatpush3.xpose.msk.msra.mxu1 %vm179_vm2, %v2148_v20  ;;  %3485 = vmatprep.mubr.msk.f32.mxu1 %vm3803_vm1, %v3802_v0 }
 0xf9d   :  { %3493 = vmatprep.subr.mxu1 %v3802_v0  ;;  %3490 = vmatprep.mubr.msk.f32.mxu0 %vm3803_vm1, %v3802_v0 }
 0xf9f   :  { %3486 = vmatmul.mubr.msk.f32.vlgmr.msra.gmra.mrb[32].mxu1 %vm179_vm2, %v2146_v31 }
 0xfa0   :  { %3495 = vmatprep.mubr.msk.f32.mxu1 %vm3803_vm1, %v3802_v0 }
0x106a   :  { %v4141_v32 = vpop.f32.mrb[16].mxu0 }
0x106b   :  { %v3472_v35 = vpop.f32.mrb[17].mxu0 }
0x106e   :  { %v4143_v36 = vpop.f32.mrb[30].mxu1  ;;  %v2141_v37 = vpop.f32.mrb[18].mxu0 }
0x106f   :  { %v2223_v39 = vmul.f32 0.25, %v2141_v37  ;;  %v3477_v41 = vpop.f32.mrb[31].mxu1  ;;  %v3482_v42 = vpop.f32.mrb[19].mxu0 }
0x1071   :  { %v2225_v44 = vsel %vm333_vm3, %v2223_v39, -inf }
0x1072   :  { %2226 = vmax.xlane.f32.xlu1 %v2225_v44  ;;  %v2219_v45 = vpop.f32.mrb[32].mxu1 }
0x1073   :  { %v2224_v9 = vmul.f32 0.25, %v2219_v45  ;;  %v3487_v46 = vpop.f32.mrb[33].mxu1 }
0x1075   :  { %v2228_v47 = vsel %vm333_vm3, %v2224_v9, -inf }
0x1076   :  { %2229 = vmax.xlane.f32.xlu0 %v2228_v47 }
0x1083   :  { %2325 = vrot.lane.b32.xlu1 %v4095_v29, %s3806_s10 }
0x1087   :  { %2403 = vrot.lane.b32.xlu1 %v4085_v59, %s3807_s11 }
0x108c   :  { %2248 = vrot.lane.b32.xlu0 %v4087_v61, %s3806_s10 }
0x10ff   :  { %v2227_v48 = vpop.xlane.xlu1 %2226 }
0x1100   :  { %v2231_v49 = vsub.f32 %v2223_v39, %v2227_v48 }
0x1102   :  { %v2233_v11 = vmul.f32 1.442695, %v2231_v49 }
0x1103   :  { %v2326_v50 = vpop.permute.xlu1 %2325  ;;  %v2230_v51 = vpop.xlane.xlu0 %2229 }
0x1104   :  { %3677 = vpow2.f32 %v2233_v11  ;;  %v2232_v53 = vsub.f32 %v2224_v9, %v2230_v51  ;;  %3494 = vmatpush3.msra.mxu1 %v2326_v50 }
0x1105   :  { %3503 = vmatprep.subr.mxu1 %v3802_v0 }
0x1106   :  { %v2235_v40 = vmul.f32 1.442695, %v2232_v53 }
0x1107   :  { %v2249_v54 = vpop.permute.xlu0 %2248  ;;  %v2404_v57 = vpop.permute.xlu1 %2403 }
0x1108   :  { %3679 = vpow2.f32 %v2235_v40  ;;  %3489 = vmatpush3.msra.mxu0 %v2249_v54 }
0x1109   :  { %3498 = vmatprep.subr.mxu0 %v3802_v0 }
0x110e   :  { %v3678_v55 = vpop.eup %3677 }
0x110f   :  { %v2237_v43 = vsel %vm333_vm3, %v3678_v55, 0.0 }
0x1110   :  { %2238 = vadd.xlane.f32.xlu0 %v2237_v43 }
0x1112   :  { %v3680_v52 = vpop.eup %3679 }
0x1113   :  { %v2240_v56 = vsel %vm333_vm3, %v3680_v52, 0.0 }
0x1114   :  { %2241 = vadd.xlane.f32.xlu1 %v2240_v56 }
0x1125   :  { %2401 = vrot.lane.b32.xlu1 %v4085_v59, %s3808_s12 }
0x1126   :  { %2481 = vrot.lane.b32.xlu0 %v4092_v63, %s3807_s11 }
0x112a   :  { %2479 = vrot.lane.b32.xlu0 %v4092_v63, %s3808_s12 }
0x119d   :  { %v2239_v58 = vpop.xlane.xlu0 %2238 }
0x119e   :  { %3681 = vrcp.f32 %v2239_v58 }
0x11a1   :  { %v2242_v60 = vpop.xlane.xlu1 %2241  ;;  %v2482_v33 = vpop.permute.xlu0 %2481 }
0x11a2   :  { %3683 = vrcp.f32 %v2242_v60 }
0x11a5   :  { %v2402_v3 = vpop.permute.xlu1 %2401  ;;  %v2480_v4 = vpop.permute.xlu0 %2479 }
0x11a8   :  { %v3682_v62 = vpop.eup %3681 }
0x11a9   :  { %v2245_v1 = vmul.f32 %v3682_v62, %v3678_v55 }
0x11ab   :  { %3491 = vmatmul.mubr.msk.f32.vlgmr.msra.gmra.mrb[20].mxu0 %vm333_vm3, %v2245_v1 }
0x11ac   :  { %v3684_v28 = vpop.eup %3683  ;;  %3499 = vmatpush3.xpose.msk.msra.mxu0 %vm179_vm2, %v2404_v57  ;;  %3500 = vmatprep.mubr.msk.f32.mxu0 %vm3803_vm1, %v3802_v0 }
0x11ad   :  { %v2246_v2 = vmul.f32 %v3684_v28, %v3680_v52  ;;  %3508 = vmatprep.subr.mxu0 %v3802_v0 }
0x11af   :  { %3496 = vmatmul.mubr.msk.f32.vlgmr.msra.gmra.mrb[34].mxu1 %vm333_vm3, %v2246_v2  ;;  %3501 = vmatmul.mubr.msk.f32.vlgmr.msra.gmra.mrb[22].mxu0 %vm179_vm2, %v2402_v3 }
0x11b0   :  { %3504 = vmatpush3.xpose.msk.msra.mxu1 %vm179_vm2, %v2482_v33  ;;  %3505 = vmatprep.mubr.msk.f32.mxu1 %vm3803_vm1, %v3802_v0 }
0x11b1   :  { %3513 = vmatprep.subr.mxu1 %v3802_v0  ;;  %3510 = vmatprep.mubr.msk.f32.mxu0 %vm3803_vm1, %v3802_v0 }
0x11b3   :  { %3506 = vmatmul.mubr.msk.f32.vlgmr.msra.gmra.mrb[36].mxu1 %vm179_vm2, %v2480_v4 }
0x11b4   :  { %3515 = vmatprep.mubr.msk.f32.mxu1 %vm3803_vm1, %v3802_v0 }
0x127e   :  { %v4179_v5 = vpop.f32.mrb[20].mxu0 }
0x127f   :  { %v3492_v6 = vpop.f32.mrb[21].mxu0 }
0x1282   :  { %v4181_v7 = vpop.f32.mrb[34].mxu1  ;;  %v2475_v34 = vpop.f32.mrb[22].mxu0 }
0x1283   :  { %v2557_v8 = vmul.f32 0.25, %v2475_v34  ;;  %v3497_v10 = vpop.f32.mrb[35].mxu1  ;;  %v3502_v12 = vpop.f32.mrb[23].mxu0  ;;  %v3097_v34 = vld [vmem:[#allocation7 + $0x48] sm:$0xff] }
0x1284   :  { %v3099_v12 = vld [vmem:[#allocation7 + $0x58] sm:$0xff] }
0x1285   :  { %v2559_v13 = vsel %vm333_vm3, %v2557_v8, -inf }
0x1286   :  { %2560 = vmax.xlane.f32.xlu1 %v2559_v13  ;;  %v2553_v14 = vpop.f32.mrb[36].mxu1 }
0x1287   :  { %v2558_v15 = vmul.f32 0.25, %v2553_v14  ;;  %v3507_v16 = vpop.f32.mrb[37].mxu1  ;;  %v3100_v14 = vld [vmem:[#allocation7 + $0x60] sm:$0xff] }
0x1289   :  { %v2562_v38 = vsel %vm333_vm3, %v2558_v15, -inf }
0x128a   :  { %2563 = vmax.xlane.f32.xlu0 %v2562_v38  ;;  %v3102_v38 = vld [vmem:[#allocation7 + $0x70] sm:$0xff] }
0x1297   :  { %2657 = vrot.lane.b32.xlu1 %v4095_v29, %s3808_s12 }
0x129b   :  { %2735 = vrot.lane.b32.xlu1 %v4085_v59, %s3797_s29 }
0x12a0   :  { %2581 = vrot.lane.b32.xlu0 %v4087_v61, %s3808_s12 }
0x1313   :  { %v2561_v17 = vpop.xlane.xlu1 %2560 }
0x1314   :  { %v2565_v18 = vsub.f32 %v2557_v8, %v2561_v17  ;;  %v3098_v8 = vld [vmem:[#allocation7 + $0x50] sm:$0xff]  ;;  %v3103_v17 = vld [vmem:[#allocation7 + $0x78] sm:$0xff] }
0x1315   :  { %v3609_v13 = vpack.c.bf16 %v3099_v12, %v3098_v8 }
0x1316   :  { %v2567_v19 = vmul.f32 1.442695, %v2565_v18  ;;  %v3617_v18 = vpack.c.bf16 %v3103_v17, %v3102_v38 }
0x1317   :  { %v2658_v20 = vpop.permute.xlu1 %2657  ;;  %v2564_v21 = vpop.xlane.xlu0 %2563 }
0x1318   :  { %3685 = vpow2.f32 %v2567_v19  ;;  %v2566_v22 = vsub.f32 %v2558_v15, %v2564_v21  ;;  %3514 = vmatpush3.msra.mxu1 %v2658_v20  ;;  %v3101_v15 = vld [vmem:[#allocation7 + $0x68] sm:$0xff] }
0x1319   :  { %3523 = vmatprep.subr.mxu1 %v3802_v0  ;;  %v3613_v16 = vpack.c.bf16 %v3101_v15, %v3100_v14 }
0x131a   :  { %v2569_v23 = vmul.f32 1.442695, %v2566_v22 }
0x131b   :  { %v2582_v24 = vpop.permute.xlu0 %2581  ;;  %v2736_v31 = vpop.permute.xlu1 %2735 }
0x131c   :  { %3687 = vpow2.f32 %v2569_v23  ;;  %3509 = vmatpush3.msra.mxu0 %v2582_v24 }
0x131d   :  { %3518 = vmatprep.subr.mxu0 %v3802_v0 }
0x1322   :  { %v3686_v25 = vpop.eup %3685 }
0x1323   :  { %v2571_v26 = vsel %vm333_vm3, %v3686_v25, 0.0 }
0x1324   :  { %2572 = vadd.xlane.f32.xlu0 %v2571_v26 }
0x1326   :  { %v3688_v27 = vpop.eup %3687 }
0x1327   :  { %v2574_v30 = vsel %vm333_vm3, %v3688_v27, 0.0 }
0x1328   :  { %2575 = vadd.xlane.f32.xlu1 %v2574_v30 }
0x1339   :  { %2733 = vrot.lane.b32.xlu1 %v4085_v59, %s3809_s13 }
0x133a   :  { %2813 = vrot.lane.b32.xlu0 %v4092_v63, %s3797_s29 }
0x133e   :  { %2811 = vrot.lane.b32.xlu0 %v4092_v63, %s3809_s13 }
0x13b1   :  { %v2573_v35 = vpop.xlane.xlu0 %2572 }
0x13b2   :  { %3689 = vrcp.f32 %v2573_v35 }
0x13b5   :  { %v2576_v37 = vpop.xlane.xlu1 %2575  ;;  %v2814_v44 = vpop.permute.xlu0 %2813 }
0x13b6   :  { %3691 = vrcp.f32 %v2576_v37 }
0x13b9   :  { %v2734_v63 = vpop.permute.xlu1 %2733  ;;  %v2812_v45 = vpop.permute.xlu0 %2811 }
0x13bc   :  { %v3690_v39 = vpop.eup %3689 }
0x13bd   :  { %v2579_v41 = vmul.f32 %v3690_v39, %v3686_v25 }
0x13bf   :  { %3511 = vmatmul.mubr.msk.f32.vlgmr.msra.gmra.mrb[24].mxu0 %vm333_vm3, %v2579_v41 }
0x13c0   :  { %v3692_v42 = vpop.eup %3691  ;;  %3519 = vmatpush3.xpose.msk.msra.mxu0 %vm179_vm2, %v2736_v31  ;;  %3520 = vmatprep.mubr.msk.f32.mxu0 %vm3803_vm1, %v3802_v0 }
0x13c1   :  { %v2580_v59 = vmul.f32 %v3692_v42, %v3688_v27  ;;  %3528 = vmatprep.subr.mxu0 %v3802_v0 }
0x13c3   :  { %3516 = vmatmul.mubr.msk.f32.vlgmr.msra.gmra.mrb[38].mxu1 %vm333_vm3, %v2580_v59  ;;  %3521 = vmatmul.mubr.msk.f32.vlgmr.msra.gmra.mrb[26].mxu0 %vm179_vm2, %v2734_v63 }
0x13c4   :  { %3524 = vmatpush3.xpose.msk.msra.mxu1 %vm179_vm2, %v2814_v44  ;;  %3525 = vmatprep.mubr.msk.f32.mxu1 %vm3803_vm1, %v3802_v0 }
0x13c5   :  { %3533 = vmatprep.subr.mxu1 %v3802_v0  ;;  %3530 = vmatprep.mubr.msk.f32.mxu0 %vm3803_vm1, %v3802_v0 }
0x13c7   :  { %3526 = vmatmul.mubr.msk.f32.vlgmr.msra.gmra.mrb[40].mxu1 %vm179_vm2, %v2812_v45 }
0x13c8   :  { %3535 = vmatprep.mubr.msk.f32.mxu1 %vm3803_vm1, %v3802_v0 }
0x1492   :  { %v2653_v9 = vpop.f32.mrb[24].mxu0 }
0x1493   :  { %v3512_v46 = vpop.f32.mrb[25].mxu0 }
0x1496   :  { %v2729_v47 = vpop.f32.mrb[38].mxu1  ;;  %v2807_v48 = vpop.f32.mrb[26].mxu0 }
0x1497   :  { %v2889_v49 = vmul.f32 0.25, %v2807_v48  ;;  %v3517_v11 = vpop.f32.mrb[39].mxu1  ;;  %v3522_v50 = vpop.f32.mrb[27].mxu0 }
0x1499   :  { %v2891_v51 = vsel %vm333_vm3, %v2889_v49, -inf }
0x149a   :  { %2892 = vmax.xlane.f32.xlu1 %v2891_v51  ;;  %v2885_v53 = vpop.f32.mrb[40].mxu1 }
0x149b   :  { %v2890_v40 = vmul.f32 0.25, %v2885_v53  ;;  %v3527_v54 = vpop.f32.mrb[41].mxu1 }
0x149d   :  { %v2894_v55 = vsel %vm333_vm3, %v2890_v40, -inf }
0x149e   :  { %2895 = vmax.xlane.f32.xlu0 %v2894_v55 }
0x1527   :  { %v2893_v43 = vpop.xlane.xlu1 %2892 }
0x1528   :  { %v2897_v52 = vsub.f32 %v2889_v49, %v2893_v43 }
0x152a   :  { %v2899_v56 = vmul.f32 1.442695, %v2897_v52 }
0x152b   :  { %v2896_v0 = vpop.xlane.xlu0 %2895 }
0x152c   :  { %3693 = vpow2.f32 %v2899_v56  ;;  %v2898_v57 = vsub.f32 %v2890_v40, %v2896_v0 }
0x152e   :  { %v2901_v58 = vmul.f32 1.442695, %v2898_v57 }
0x1530   :  { %3695 = vpow2.f32 %v2901_v58 }
0x1536   :  { %v3694_v60 = vpop.eup %3693 }
0x1537   :  { %v2903_v62 = vsel %vm333_vm3, %v3694_v60, 0.0 }
0x1538   :  { %2904 = vadd.xlane.f32.xlu0 %v2903_v62 }
0x153a   :  { %v3696_v1 = vpop.eup %3695 }
0x153b   :  { %v2906_v28 = vsel %vm333_vm3, %v3696_v1, 0.0 }
0x153c   :  { %2907 = vadd.xlane.f32.xlu1 %v2906_v28 }
0x154d   :  { %2989 = vrot.lane.b32.xlu1 %v4095_v29, %s3809_s13 }
0x154e   :  { %2913 = vrot.lane.b32.xlu0 %v4087_v61, %s3809_s13 }
0x1551   :  { %3067 = vrot.lane.b32.xlu1 %v4179_v5, %s3797_s29 }
0x1552   :  { %3069 = vrot.lane.b32.xlu0 %v4181_v7, %s3797_s29  ;;  %v3096_v7 = vld [vmem:[#allocation7 + $0x40] sm:$0xff] }
0x1553   :  { %v3605_v10 = vpack.c.bf16 %v3097_v34, %v3096_v7 }
0x1555   :  { %3075 = vrot.lane.b32.xlu1 %v2653_v9, %s3807_s11 }
0x1556   :  { %3077 = vrot.lane.b32.xlu0 %v2729_v47, %s3807_s11 }
0x15c5   :  { %v2905_v33 = vpop.xlane.xlu0 %2904 }
0x15c6   :  { %3697 = vrcp.f32 %v2905_v33 }
0x15c9   :  { %v2908_v2 = vpop.xlane.xlu1 %2907  ;;  %v2914_v3 = vpop.permute.xlu0 %2913 }
0x15ca   :  { %3699 = vrcp.f32 %v2908_v2  ;;  %3529 = vmatpush3.msra.mxu0 %v2914_v3 }
0x15cb   :  { %3606 = vmatprep.subr.bf16.mxu0 %v3605_v10 }
0x15cd   :  { %v2990_v29 = vpop.permute.xlu1 %2989  ;;  %v3070_v24 = vpop.permute.xlu0 %3069 }
0x15ce   :  { %3534 = vmatpush3.msra.mxu1 %v2990_v29  ;;  %v3090_v37 = vsel %vm179_vm2, %v4143_v36, %v3070_v24 }
0x15d0   :  { %v3698_v4 = vpop.eup %3697 }
0x15d1   :  { %v2911_v61 = vmul.f32 %v3698_v4, %v3694_v60  ;;  %v3068_v23 = vpop.permute.xlu1 %3067  ;;  %v3078_v27 = vpop.permute.xlu0 %3077 }
0x15d2   :  { %v3089_v26 = vsel %vm179_vm2, %v4141_v32, %v3068_v23  ;;  %v3092_v39 = vsel %vm1526_vm4, %v3090_v37, %v3078_v27  ;;  %v3272_v32 = vld [vmem:[%s4269_s4 + $0x1] ss:$0 sm:$0xff] }
0x15d3   :  { %3531 = vmatmul.mubr.msk.f32.vlgmr.msra.gmra.mrb[28].mxu0 %vm333_vm3, %v2911_v61 }
0x15d4   :  { %v3700_v5 = vpop.eup %3699  ;;  %3608 = vmatpush3.bf16.msra.mxu0 %v3605_v10 }
0x15d5   :  { %v2912_v6 = vmul.f32 %v3700_v5, %v3696_v1  ;;  %3610 = vmatprep.subr.bf16.mxu0 %v3609_v13  ;;  %v3076_v25 = vpop.permute.xlu1 %3075 }
0x15d6   :  { %v3091_v30 = vsel %vm1526_vm4, %v3089_v26, %v3076_v25 }
0x15d7   :  { %3536 = vmatmul.mubr.msk.f32.vlgmr.msra.gmra.mrb[42].mxu1 %vm333_vm3, %v2912_v6 }
0x15d8   :  { %3612 = vmatpush3.bf16.msra.mxu0 %v3609_v13 }
0x15d9   :  { %3614 = vmatprep.subr.bf16.mxu0 %v3613_v16 }
0x15dc   :  { %3616 = vmatpush3.bf16.msra.mxu0 %v3613_v16 }
0x15dd   :  { %3618 = vmatprep.subr.bf16.mxu0 %v3617_v18 }
0x15e0   :  { %3620 = vmatpush3.bf16.msra.mxu0 %v3617_v18 }
0x16a6   :  { %v2985_v19 = vpop.f32.mrb[28].mxu0 }
0x16a7   :  { %3083 = vrot.lane.b32.xlu1 %v2985_v19, %s3805_s9  ;;  %v3532_v20 = vpop.f32.mrb[29].mxu0 }
0x16aa   :  { %v3061_v21 = vpop.f32.mrb[42].mxu1 }
0x16ab   :  { %3085 = vrot.lane.b32.xlu0 %v3061_v21, %s3805_s9  ;;  %v3537_v22 = vpop.f32.mrb[43].mxu1 }
0x1719   :  { %v3084_v31 = vpop.permute.xlu1 %3083 }
0x171a   :  { %v3093_v35 = vsel %vm1529_vm5, %v3091_v30, %v3084_v31 }
0x171b   :  { %3554 = vmatprep.mubr.msk.f32.mxu0 %vm92_vm0, %v3093_v35 }
0x171d   :  { %v3086_v41 = vpop.permute.xlu0 %3085 }
0x171e   :  { %v3094_v42 = vsel %vm1529_vm5, %v3092_v39, %v3086_v41 }
0x171f   :  { %3555 = vmatmul.mubr.msk.f32.vlgmr.msra.gmra.mrb[30].mxu0 %vm92_vm0, %v3094_v42 }
0x17f2   :  { %v3556_v44 = vpop.f32.mrb[30].mxu0 }
0x17f3   :  { %v3190_v59 = vadd.f32 %v3556_v44, %v3272_v32  ;;  %v3184_v63 = vpop.f32.mrb[31].mxu0 }
0x17f4   :  { %v3185_v45 = vadd.f32 %v3272_v32, %v3184_v63 }
0x17f5   :  { %v3194_v9 = vmax.f32 %v3190_v59, 0.0 }
0x17f6   :  { %v3193_v46 = vmax.f32 %v3185_v45, 0.0 }
0x17f7   :  { %3196 = vst.msk [vmem:[#allocation8 + $0x8] sm:$0xff] %vm92_vm0, %v3194_v9 }
0x17f8   :  { %3195 = vst.msk [vmem:[#allocation8] sm:$0xff] %vm92_vm0, %v3193_v46 }
0x17f9   :  { %3778 = shalt.err (!%p3775_p0)
}
0x17fa   :  { %s3779_s23 = scalar_lea.hbm %s4270_s5, 256 }
0x17fb   :  { %p3780_p1 = scmp.ne.s32.totalorder %s4270_s5, %s3779_s23  ;;  %p3783_p2 = scmp.lt.u32.totalorder %s3779_s23, %s4270_s5 }
0x17fd   :  { %p3785_p3 = pnand %p3783_p2, %p3780_p1 }
0x17ff   :  { %3788 = shalt.err (!%p3785_p3)
}
0x1800   :  { %3208 = dma.vmem_to_hbm [thread:$0]  %s3203_s20, 256, %s4270_s5, [#allocation4], %s3799_s1, %s3799_s1, %s3800_s17  }
0x1801   :  { %3793 = dma.done.wait [#allocation4], 256  }
0x1802   :  { %3794 = vsyncadd [#allocation4], 4294967040 }
0x1803   :  { %3212 = vsyncpa [#allocation3], 1 }
0x1804   :  { %3213 = vsyncpa [#allocation6], 1 }
0x1805   :  { %3214 = vsyncpa [#allocation4], 1 }

</bundles_post_ra>
